<compile_context>
chip_gen: v5e
topology: v5e:2x2
jax: 0.10.0
libtpu: 0.0.40
codegen_flags: <defaults>
</compile_context>

<pallas_src>
import jax
import jax.numpy as jnp
import numpy as np
from jax.experimental import pallas as pl
from jax.experimental.pallas import tpu as pltpu

_BN_EPS = 1e-5


def _fused_conv_net_kernel(x_ref, b0_ref, s0_ref, t0_ref,
                           b1_ref, s1_ref, t1_ref, o_ref,
                           xscr_ref, yscr_ref):
    """Both Conv3d+BN+ReLU layers for one batch element, fully in VMEM.

    x_ref  : (1, D, H*W*Cin)            unpadded input, (h, w, c) merged in lanes
    b0_ref : (3, H*W*Cin, H*W*Cmid)     banded weights of layer 0, one per kd
    s0_ref : (1, H*W*Cmid)              folded BN scale (tiled over h, w)
    t0_ref : (1, H*W*Cmid)              folded BN shift
    b1_ref : (3, H*W*Cmid, H*W*Cout)    banded weights of layer 1
    s1_ref : (1, H*W*Cout)
    t1_ref : (1, H*W*Cout)
    o_ref  : (1, D, H*W*Cout)           lane-dense output block
    xscr_ref: (D+2, H*W*Cin)   VMEM scratch: D-padded input
    yscr_ref: (D+2, H*W*Cmid)  VMEM scratch: D-padded intermediate activation
    """
    d = xscr_ref.shape[0] - 2
    hwc0 = xscr_ref.shape[1]
    hwc1 = yscr_ref.shape[1]
    hwc2 = o_ref.shape[2]
    cdt = xscr_ref.dtype

    # Zero ONLY the D-halo rows (2 rows per scratch).  Done every step so it
    # stays correct when the batch grid axis is sharded across TensorCores
    # ("parallel" semantics); the interior is fully overwritten below.
    zero0 = jnp.zeros((1, hwc0), cdt)
    xscr_ref[0:1, :] = zero0
    xscr_ref[d + 1:d + 2, :] = zero0
    zero1 = jnp.zeros((1, hwc1), cdt)
    yscr_ref[0:1, :] = zero1
    yscr_ref[d + 1:d + 2, :] = zero1

    # D-pad the input on-chip (no jnp.pad HBM round trip in the wrapper).
    xscr_ref[1:1 + d, :] = x_ref[0].astype(cdt)

    # ---------------- layer 0: Conv3d(Cin->Cin) + BN + ReLU -----------------
    # 3 big-K matmuls; kh/kw shifts + H/W zero-padding live in the band.
    acc0 = jnp.zeros((d, hwc1), jnp.float32)
    for kd in range(3):
        acc0 = acc0 + jnp.dot(xscr_ref[kd:kd + d, :], b0_ref[kd],
                              preferred_element_type=jnp.float32)
    y0 = jnp.maximum(acc0 * s0_ref[...] + t0_ref[...], 0.0)
    # Intermediate stays on-chip (D-padded in the second scratch).
    yscr_ref[1:1 + d, :] = y0.astype(cdt)

    # ---------------- layer 1: Conv3d(Cin->Cout) + BN + ReLU ----------------
    acc1 = jnp.zeros((d, hwc2), jnp.float32)
    for kd in range(3):
        acc1 = acc1 + jnp.dot(yscr_ref[kd:kd + d, :], b1_ref[kd],
                              preferred_element_type=jnp.float32)
    y1 = jnp.maximum(acc1 * s1_ref[...] + t1_ref[...], 0.0)
    o_ref[0] = y1.astype(o_ref.dtype)


def _banded_weights_hw(w_dhwio, hdim, wdim):
    """(3,3,3,Ci,Co) conv weight -> (3, H*W*Ci, H*W*Co) banded matrices.

    B[kd, (h_in*W + w_in)*Ci + ci, (h_out*W + w_out)*Co + co] =
        w[kd, kh, kw, ci, co]   with kh = h_in - h_out + 1, kw = w_in - w_out + 1
    when both offsets are in {0,1,2}; 0 otherwise.  Band clipping at the matrix
    edges implements the H/W zero padding of the conv.

    NOTE: this trades ~H/3 extra zero-band FLOPs for full-K/N MXU tiles and
    3 taps instead of 9.  Clear win at small H; for large H prefer K-stacking
    the 9 shifted slabs into one K=9*W*Cin matmul (no FLOP waste).
    """
    kD, kH, kW, ci, co = w_dhwio.shape
    sel_h = np.zeros((kH, hdim, hdim), np.float32)
    for kh in range(kH):
        for h in range(hdim):
            hp = h + kh - 1
            if 0 <= hp < hdim:
                sel_h[kh, hp, h] = 1.0
    sel_w = np.zeros((kW, wdim, wdim), np.float32)
    for kw in range(kW):
        for w in range(wdim):
            wp = w + kw - 1
            if 0 <= wp < wdim:
                sel_w[kw, wp, w] = 1.0
    # indices: a=kh, p=h_in, q=h_out ; b=kw, x=w_in, y=w_out ; d=kd, i=ci, o=co
    b = jnp.einsum('apq,bxy,dabio->dpxiqyo',
                   jnp.asarray(sel_h), jnp.asarray(sel_w), w_dhwio)
    return b.reshape(kD, hdim * wdim * ci, hdim * wdim * co)


def _fold_bn(conv_bias, gamma, beta, mean, var, reps, eps=_BN_EPS):
    s = gamma / jnp.sqrt(var + eps)
    scale = jnp.tile(s, reps).reshape(1, -1).astype(jnp.float32)
    shift = jnp.tile((conv_bias - mean) * s + beta, reps).reshape(1, -1)
    return scale, shift.astype(jnp.float32)


def conv_net_forward(x_ncdhw, params, *, compute_dtype=jnp.bfloat16):
    """Matches conv_net.forward (eval mode).  Input/output are NCDHW.

    compute_dtype=bf16 (default) halves activation/weight DMA bytes and feeds
    the MXU at bf16 rate; accumulation and the BN+ReLU epilogue stay f32.
    Use compute_dtype=jnp.float32 for tight-tolerance comparison vs. PyTorch.
    """
    n, cin, d, h, w = x_ncdhw.shape
    cmid = params["w0"].shape[4]
    cout = params["w1"].shape[4]
    hwc0, hwc1, hwc2 = h * w * cin, h * w * cmid, h * w * cout

    # NCDHW -> NDHWC, merge (H, W, C) into the lane dimension.  No jnp.pad:
    # D padding is done in-kernel, H/W padding is folded into the band.
    x = jnp.transpose(x_ncdhw, (0, 2, 3, 4, 1)).reshape(n, d, hwc0)
    x = x.astype(compute_dtype)

    b0 = _banded_weights_hw(params["w0"], h, w).astype(compute_dtype)
    b1 = _banded_weights_hw(params["w1"], h, w).astype(compute_dtype)
    s0, t0 = _fold_bn(params["b0"], params["g0"], params["be0"],
                      params["m0"], params["v0"], h * w)
    s1, t1 = _fold_bn(params["b1"], params["g1"], params["be1"],
                      params["m1"], params["v1"], h * w)

    # TODO(synk): for large volumes, add a second "parallel" grid axis tiling
    # D (1-plane halo) so per-step M lands in 128-512 and both v7x TCs stay
    # busy at N==1; size tiles against v7x's 64 MiB VMEM.
    out = pl.pallas_call(
        _fused_conv_net_kernel,
        out_shape=jax.ShapeDtypeStruct((n, d, hwc2), jnp.float32),
        grid=(n,),
        in_specs=[
            pl.BlockSpec((1, d, hwc0), lambda i: (i, 0, 0)),
            pl.BlockSpec((3, hwc0, hwc1), lambda i: (0, 0, 0)),
            pl.BlockSpec((1, hwc1), lambda i: (0, 0)),
            pl.BlockSpec((1, hwc1), lambda i: (0, 0)),
            pl.BlockSpec((3, hwc1, hwc2), lambda i: (0, 0, 0)),
            pl.BlockSpec((1, hwc2), lambda i: (0, 0)),
            pl.BlockSpec((1, hwc2), lambda i: (0, 0)),
        ],
        out_specs=pl.BlockSpec((1, d, hwc2), lambda i: (i, 0, 0)),
        scratch_shapes=[
            pltpu.VMEM((d + 2, hwc0), compute_dtype),
            pltpu.VMEM((d + 2, hwc1), compute_dtype),
        ],
        compiler_params=pltpu.CompilerParams(
            dimension_semantics=("parallel",),
            vmem_limit_bytes=32 * 1024 * 1024,
        ),
    )(x, b0, s0, t0, b1, s1, t1)

    out = out.reshape(n, d, h, w, cout)
    return jnp.transpose(out, (0, 4, 1, 2, 3))  # NDHWC -> NCDHW


def init_params(key, in_channels, out_channels):
    ks = jax.random.split(key, 12)
    p = {}
    # conv0: Conv3d(in, in, 3), BatchNorm3d(in)
    p["w0"] = 0.1 * jax.random.normal(ks[0], (3, 3, 3, in_channels, in_channels), jnp.float32)
    p["b0"] = 0.05 * jax.random.normal(ks[1], (in_channels,), jnp.float32)
    p["g0"] = 1.0 + 0.1 * jax.random.normal(ks[2], (in_channels,), jnp.float32)
    p["be0"] = 0.1 * jax.random.normal(ks[3], (in_channels,), jnp.float32)
    p["m0"] = 0.1 * jax.random.normal(ks[4], (in_channels,), jnp.float32)
    p["v0"] = 0.5 + jax.random.uniform(ks[5], (in_channels,), jnp.float32)
    # conv1: Conv3d(in, out, 3), BatchNorm3d(out)
    p["w1"] = 0.1 * jax.random.normal(ks[6], (3, 3, 3, in_channels, out_channels), jnp.float32)
    p["b1"] = 0.05 * jax.random.normal(ks[7], (out_channels,), jnp.float32)
    p["g1"] = 1.0 + 0.1 * jax.random.normal(ks[8], (out_channels,), jnp.float32)
    p["be1"] = 0.1 * jax.random.normal(ks[9], (out_channels,), jnp.float32)
    p["m1"] = 0.1 * jax.random.normal(ks[10], (out_channels,), jnp.float32)
    p["v1"] = 0.5 + jax.random.uniform(ks[11], (out_channels,), jnp.float32)
    return p


def reference_forward(x_ncdhw, params):
    """Pure-JAX reference (lax conv) for correctness checking."""
    x = jnp.transpose(x_ncdhw, (0, 2, 3, 4, 1))

    def block(x, w, b, g, be, m, v):
        y = jax.lax.conv_general_dilated(
            x, w, window_strides=(1, 1, 1), padding=((1, 1),) * 3,
            dimension_numbers=("NDHWC", "DHWIO", "NDHWC"))
        y = y + b
        y = g * (y - m) / jnp.sqrt(v + _BN_EPS) + be
        return jnp.maximum(y, 0.0)

    x = block(x, params["w0"], params["b0"], params["g0"], params["be0"],
              params["m0"], params["v0"])
    x = block(x, params["w1"], params["b1"], params["g1"], params["be1"],
              params["m1"], params["v1"])
    return jnp.transpose(x, (0, 4, 1, 2, 3))


if __name__ == "__main__":
    key = jax.random.PRNGKey(0)
    k_x, k_p = jax.random.split(key)

    N, Cin, Cout, D, H, W = 2, 4, 8, 8, 8, 8
    x = jax.random.normal(k_x, (N, Cin, D, H, W), jnp.float32)  # NCDHW like PyTorch
    params = init_params(k_p, Cin, Cout)

    ref = jax.block_until_ready(reference_forward(x, params))

    # f32 path: bit-tight check against the lax reference.
    out_f32 = jax.block_until_ready(
        conv_net_forward(x, params, compute_dtype=jnp.float32))
    assert out_f32.shape == (N, Cout, D, H, W), out_f32.shape
    assert jnp.allclose(out_f32, ref, rtol=1e-4, atol=1e-4), \
        float(jnp.max(jnp.abs(out_f32 - ref)))

    # bf16 default path (perf config): loose tolerance (inputs/weights and the
    # on-chip intermediate are bf16; accumulation/epilogue are f32).
    out_bf16 = jax.block_until_ready(conv_net_forward(x, params))
    assert out_bf16.shape == (N, Cout, D, H, W), out_bf16.shape
    assert jnp.allclose(out_bf16, ref, rtol=1e-1, atol=1e-1), \
        float(jnp.max(jnp.abs(out_bf16 - ref)))

    print("KERNEL_OK")
</pallas_src>

<mosaic_0001>
module attributes {stable_mosaic.version = 11 : i64} {
  func.func @_fused_conv_net_kernel(%arg0: i32, %arg1: memref<1x8x256xf32, #tpu.memory_space<vmem>>, %arg2: memref<3x256x256xf32, #tpu.memory_space<vmem>>, %arg3: memref<1x256xf32, #tpu.memory_space<vmem>>, %arg4: memref<1x256xf32, #tpu.memory_space<vmem>>, %arg5: memref<3x256x512xf32, #tpu.memory_space<vmem>>, %arg6: memref<1x512xf32, #tpu.memory_space<vmem>>, %arg7: memref<1x512xf32, #tpu.memory_space<vmem>>, %arg8: memref<1x8x512xf32, #tpu.memory_space<vmem>>, %arg9: memref<10x256xf32, #tpu.memory_space<vmem>>, %arg10: memref<10x256xf32, #tpu.memory_space<vmem>>) attributes {dimension_semantics = [#tpu.dimension_semantics<parallel>], iteration_bounds = array<i64: 2>, scalar_prefetch = 0 : i64, scratch_operands = 2 : i64, tpu.core_type = #tpu.core_type<tc>, window_params = [{transform_indices = @transform_0, window_bounds = array<i64: 1, 8, 256>}, {pipeline_mode = #tpu.pipeline_mode<synchronous>, transform_indices = @transform_1, window_bounds = array<i64: 3, 256, 256>}, {pipeline_mode = #tpu.pipeline_mode<synchronous>, transform_indices = @transform_2, window_bounds = array<i64: 1, 256>}, {pipeline_mode = #tpu.pipeline_mode<synchronous>, transform_indices = @transform_3, window_bounds = array<i64: 1, 256>}, {pipeline_mode = #tpu.pipeline_mode<synchronous>, transform_indices = @transform_4, window_bounds = array<i64: 3, 256, 512>}, {pipeline_mode = #tpu.pipeline_mode<synchronous>, transform_indices = @transform_5, window_bounds = array<i64: 1, 512>}, {pipeline_mode = #tpu.pipeline_mode<synchronous>, transform_indices = @transform_6, window_bounds = array<i64: 1, 512>}, {transform_indices = @transform_7, window_bounds = array<i64: 1, 8, 512>}]} {
    %cst = arith.constant 0.000000e+00 : f32
    %0 = vector.broadcast %cst : f32 to vector<1x256xf32>
    %c0 = arith.constant 0 : index
    %c0_0 = arith.constant 0 : index
    %1 = vector.load %arg9[%c0, %c0_0] : memref<10x256xf32, #tpu.memory_space<vmem>>, vector<1x256xf32>
    tpu.vector_store %arg9[%c0, %c0_0], %0 {strides = array<i32>} : memref<10x256xf32, #tpu.memory_space<vmem>>, vector<1x256xf32>,
    %c9 = arith.constant 9 : index
    %c0_1 = arith.constant 0 : index
    %2 = vector.load %arg9[%c9, %c0_1] : memref<10x256xf32, #tpu.memory_space<vmem>>, vector<1x256xf32>
    tpu.vector_store %arg9[%c9, %c0_1], %0 {strides = array<i32>} : memref<10x256xf32, #tpu.memory_space<vmem>>, vector<1x256xf32>,
    %cst_2 = arith.constant 0.000000e+00 : f32
    %3 = vector.broadcast %cst_2 : f32 to vector<1x256xf32>
    %c0_3 = arith.constant 0 : index
    %c0_4 = arith.constant 0 : index
    %4 = vector.load %arg10[%c0_3, %c0_4] : memref<10x256xf32, #tpu.memory_space<vmem>>, vector<1x256xf32>
    tpu.vector_store %arg10[%c0_3, %c0_4], %3 {strides = array<i32>} : memref<10x256xf32, #tpu.memory_space<vmem>>, vector<1x256xf32>,
    %c9_5 = arith.constant 9 : index
    %c0_6 = arith.constant 0 : index
    %5 = vector.load %arg10[%c9_5, %c0_6] : memref<10x256xf32, #tpu.memory_space<vmem>>, vector<1x256xf32>
    tpu.vector_store %arg10[%c9_5, %c0_6], %3 {strides = array<i32>} : memref<10x256xf32, #tpu.memory_space<vmem>>, vector<1x256xf32>,
    %c0_7 = arith.constant 0 : index
    %c0_8 = arith.constant 0 : index
    %c0_9 = arith.constant 0 : index
    %6 = vector.load %arg1[%c0_7, %c0_8, %c0_9] : memref<1x8x256xf32, #tpu.memory_space<vmem>>, vector<1x8x256xf32>
    %7 = vector.shape_cast %6 : vector<1x8x256xf32> to vector<8x256xf32>
    %c1 = arith.constant 1 : index
    %c0_10 = arith.constant 0 : index
    %8 = vector.load %arg9[%c1, %c0_10] : memref<10x256xf32, #tpu.memory_space<vmem>>, vector<8x256xf32>
    tpu.vector_store %arg9[%c1, %c0_10], %7 {strides = array<i32>} : memref<10x256xf32, #tpu.memory_space<vmem>>, vector<8x256xf32>,
    %cst_11 = arith.constant 0.000000e+00 : f32
    %9 = vector.broadcast %cst_11 : f32 to vector<8x256xf32>
    %c0_12 = arith.constant 0 : index
    %c0_13 = arith.constant 0 : index
    %10 = vector.load %arg9[%c0_12, %c0_13] : memref<10x256xf32, #tpu.memory_space<vmem>>, vector<8x256xf32>
    %c0_14 = arith.constant 0 : index
    %c0_15 = arith.constant 0 : index
    %c0_16 = arith.constant 0 : index
    %11 = vector.load %arg2[%c0_14, %c0_15, %c0_16] : memref<3x256x256xf32, #tpu.memory_space<vmem>>, vector<1x256x256xf32>
    %12 = vector.shape_cast %11 : vector<1x256x256xf32> to vector<256x256xf32>
    %cst_17 = arith.constant dense<0.000000e+00> : vector<8x256xf32>
    %13 = tpu.matmul %10, %12, %cst_17 {dimension_numbers = #tpu.dot_dimension_numbers<[1], [0], [0], [1], [0, 0, 1, 1], [], []>} : vector<8x256xf32>, vector<256x256xf32>, vector<8x256xf32> -> vector<8x256xf32>
    %14 = arith.addf %9, %13 : vector<8x256xf32>
    %c1_18 = arith.constant 1 : index
    %c0_19 = arith.constant 0 : index
    %15 = vector.load %arg9[%c1_18, %c0_19] : memref<10x256xf32, #tpu.memory_space<vmem>>, vector<8x256xf32>
    %c1_20 = arith.constant 1 : index
    %c0_21 = arith.constant 0 : index
    %c0_22 = arith.constant 0 : index
    %16 = vector.load %arg2[%c1_20, %c0_21, %c0_22] : memref<3x256x256xf32, #tpu.memory_space<vmem>>, vector<1x256x256xf32>
    %17 = vector.shape_cast %16 : vector<1x256x256xf32> to vector<256x256xf32>
    %cst_23 = arith.constant dense<0.000000e+00> : vector<8x256xf32>
    %18 = tpu.matmul %15, %17, %cst_23 {dimension_numbers = #tpu.dot_dimension_numbers<[1], [0], [0], [1], [0, 0, 1, 1], [], []>} : vector<8x256xf32>, vector<256x256xf32>, vector<8x256xf32> -> vector<8x256xf32>
    %19 = arith.addf %14, %18 : vector<8x256xf32>
    %c2 = arith.constant 2 : index
    %c0_24 = arith.constant 0 : index
    %20 = vector.load %arg9[%c2, %c0_24] : memref<10x256xf32, #tpu.memory_space<vmem>>, vector<8x256xf32>
    %c2_25 = arith.constant 2 : index
    %c0_26 = arith.constant 0 : index
    %c0_27 = arith.constant 0 : index
    %21 = vector.load %arg2[%c2_25, %c0_26, %c0_27] : memref<3x256x256xf32, #tpu.memory_space<vmem>>, vector<1x256x256xf32>
    %22 = vector.shape_cast %21 : vector<1x256x256xf32> to vector<256x256xf32>
    %cst_28 = arith.constant dense<0.000000e+00> : vector<8x256xf32>
    %23 = tpu.matmul %20, %22, %cst_28 {dimension_numbers = #tpu.dot_dimension_numbers<[1], [0], [0], [1], [0, 0, 1, 1], [], []>} : vector<8x256xf32>, vector<256x256xf32>, vector<8x256xf32> -> vector<8x256xf32>
    %24 = arith.addf %19, %23 : vector<8x256xf32>
    %c0_29 = arith.constant 0 : index
    %c0_30 = arith.constant 0 : index
    %25 = vector.load %arg3[%c0_29, %c0_30] : memref<1x256xf32, #tpu.memory_space<vmem>>, vector<1x256xf32>
    %26 = vector.broadcast %25 : vector<1x256xf32> to vector<8x256xf32>
    %27 = arith.mulf %24, %26 : vector<8x256xf32>
    %c0_31 = arith.constant 0 : index
    %c0_32 = arith.constant 0 : index
    %28 = vector.load %arg4[%c0_31, %c0_32] : memref<1x256xf32, #tpu.memory_space<vmem>>, vector<1x256xf32>
    %29 = vector.broadcast %28 : vector<1x256xf32> to vector<8x256xf32>
    %30 = arith.addf %27, %29 : vector<8x256xf32>
    %cst_33 = arith.constant 0.000000e+00 : f32
    %31 = vector.broadcast %cst_33 : f32 to vector<8x256xf32>
    %32 = arith.maximumf %30, %31 : vector<8x256xf32>
    %c1_34 = arith.constant 1 : index
    %c0_35 = arith.constant 0 : index
    %33 = vector.load %arg10[%c1_34, %c0_35] : memref<10x256xf32, #tpu.memory_space<vmem>>, vector<8x256xf32>
    tpu.vector_store %arg10[%c1_34, %c0_35], %32 {strides = array<i32>} : memref<10x256xf32, #tpu.memory_space<vmem>>, vector<8x256xf32>,
    %cst_36 = arith.constant 0.000000e+00 : f32
    %34 = vector.broadcast %cst_36 : f32 to vector<8x512xf32>
    %c0_37 = arith.constant 0 : index
    %c0_38 = arith.constant 0 : index
    %35 = vector.load %arg10[%c0_37, %c0_38] : memref<10x256xf32, #tpu.memory_space<vmem>>, vector<8x256xf32>
    %c0_39 = arith.constant 0 : index
    %c0_40 = arith.constant 0 : index
    %c0_41 = arith.constant 0 : index
    %36 = vector.load %arg5[%c0_39, %c0_40, %c0_41] : memref<3x256x512xf32, #tpu.memory_space<vmem>>, vector<1x256x512xf32>
    %37 = vector.shape_cast %36 : vector<1x256x512xf32> to vector<256x512xf32>
    %cst_42 = arith.constant dense<0.000000e+00> : vector<8x512xf32>
    %38 = tpu.matmul %35, %37, %cst_42 {dimension_numbers = #tpu.dot_dimension_numbers<[1], [0], [0], [1], [0, 0, 1, 1], [], []>} : vector<8x256xf32>, vector<256x512xf32>, vector<8x512xf32> -> vector<8x512xf32>
    %39 = arith.addf %34, %38 : vector<8x512xf32>
    %c1_43 = arith.constant 1 : index
    %c0_44 = arith.constant 0 : index
    %40 = vector.load %arg10[%c1_43, %c0_44] : memref<10x256xf32, #tpu.memory_space<vmem>>, vector<8x256xf32>
    %c1_45 = arith.constant 1 : index
    %c0_46 = arith.constant 0 : index
    %c0_47 = arith.constant 0 : index
    %41 = vector.load %arg5[%c1_45, %c0_46, %c0_47] : memref<3x256x512xf32, #tpu.memory_space<vmem>>, vector<1x256x512xf32>
    %42 = vector.shape_cast %41 : vector<1x256x512xf32> to vector<256x512xf32>
    %cst_48 = arith.constant dense<0.000000e+00> : vector<8x512xf32>
    %43 = tpu.matmul %40, %42, %cst_48 {dimension_numbers = #tpu.dot_dimension_numbers<[1], [0], [0], [1], [0, 0, 1, 1], [], []>} : vector<8x256xf32>, vector<256x512xf32>, vector<8x512xf32> -> vector<8x512xf32>
    %44 = arith.addf %39, %43 : vector<8x512xf32>
    %c2_49 = arith.constant 2 : index
    %c0_50 = arith.constant 0 : index
    %45 = vector.load %arg10[%c2_49, %c0_50] : memref<10x256xf32, #tpu.memory_space<vmem>>, vector<8x256xf32>
    %c2_51 = arith.constant 2 : index
    %c0_52 = arith.constant 0 : index
    %c0_53 = arith.constant 0 : index
    %46 = vector.load %arg5[%c2_51, %c0_52, %c0_53] : memref<3x256x512xf32, #tpu.memory_space<vmem>>, vector<1x256x512xf32>
    %47 = vector.shape_cast %46 : vector<1x256x512xf32> to vector<256x512xf32>
    %cst_54 = arith.constant dense<0.000000e+00> : vector<8x512xf32>
    %48 = tpu.matmul %45, %47, %cst_54 {dimension_numbers = #tpu.dot_dimension_numbers<[1], [0], [0], [1], [0, 0, 1, 1], [], []>} : vector<8x256xf32>, vector<256x512xf32>, vector<8x512xf32> -> vector<8x512xf32>
    %49 = arith.addf %44, %48 : vector<8x512xf32>
    %c0_55 = arith.constant 0 : index
    %c0_56 = arith.constant 0 : index
    %50 = vector.load %arg6[%c0_55, %c0_56] : memref<1x512xf32, #tpu.memory_space<vmem>>, vector<1x512xf32>
    %51 = vector.broadcast %50 : vector<1x512xf32> to vector<8x512xf32>
    %52 = arith.mulf %49, %51 : vector<8x512xf32>
    %c0_57 = arith.constant 0 : index
    %c0_58 = arith.constant 0 : index
    %53 = vector.load %arg7[%c0_57, %c0_58] : memref<1x512xf32, #tpu.memory_space<vmem>>, vector<1x512xf32>
    %54 = vector.broadcast %53 : vector<1x512xf32> to vector<8x512xf32>
    %55 = arith.addf %52, %54 : vector<8x512xf32>
    %cst_59 = arith.constant 0.000000e+00 : f32
    %56 = vector.broadcast %cst_59 : f32 to vector<8x512xf32>
    %57 = arith.maximumf %55, %56 : vector<8x512xf32>
    %c0_60 = arith.constant 0 : index
    %c0_61 = arith.constant 0 : index
    %c0_62 = arith.constant 0 : index
    %58 = vector.load %arg8[%c0_60, %c0_61, %c0_62] : memref<1x8x512xf32, #tpu.memory_space<vmem>>, vector<1x8x512xf32>
    %59 = vector.shape_cast %58 : vector<1x8x512xf32> to vector<8x512xf32>
    %60 = vector.shape_cast %57 : vector<8x512xf32> to vector<1x8x512xf32>
    tpu.vector_store %arg8[%c0_60, %c0_61, %c0_62], %60 {strides = array<i32>} : memref<1x8x512xf32, #tpu.memory_space<vmem>>, vector<1x8x512xf32>,
    return
  }
  func.func @transform_0(%arg0: i32) -> (i32, i32, i32) {
    %c0_i32 = arith.constant 0 : i32
    %c0_i32_0 = arith.constant 0 : i32
    %c0_i32_1 = arith.constant 0 : i32
    return %arg0, %c0_i32, %c0_i32_0 : i32, i32, i32
  }
  func.func @transform_1(%arg0: i32) -> (i32, i32, i32) {
    %c0_i32 = arith.constant 0 : i32
    %c0_i32_0 = arith.constant 0 : i32
    %c0_i32_1 = arith.constant 0 : i32
    %c0_i32_2 = arith.constant 0 : i32
    return %c0_i32, %c0_i32_0, %c0_i32_1 : i32, i32, i32
  }
  func.func @transform_2(%arg0: i32) -> (i32, i32) {
    %c0_i32 = arith.constant 0 : i32
    %c0_i32_0 = arith.constant 0 : i32
    %c0_i32_1 = arith.constant 0 : i32
    return %c0_i32, %c0_i32_0 : i32, i32
  }
  func.func @transform_3(%arg0: i32) -> (i32, i32) {
    %c0_i32 = arith.constant 0 : i32
    %c0_i32_0 = arith.constant 0 : i32
    %c0_i32_1 = arith.constant 0 : i32
    return %c0_i32, %c0_i32_0 : i32, i32
  }
  func.func @transform_4(%arg0: i32) -> (i32, i32, i32) {
    %c0_i32 = arith.constant 0 : i32
    %c0_i32_0 = arith.constant 0 : i32
    %c0_i32_1 = arith.constant 0 : i32
    %c0_i32_2 = arith.constant 0 : i32
    return %c0_i32, %c0_i32_0, %c0_i32_1 : i32, i32, i32
  }
  func.func @transform_5(%arg0: i32) -> (i32, i32) {
    %c0_i32 = arith.constant 0 : i32
    %c0_i32_0 = arith.constant 0 : i32
    %c0_i32_1 = arith.constant 0 : i32
    return %c0_i32, %c0_i32_0 : i32, i32
  }
  func.func @transform_6(%arg0: i32) -> (i32, i32) {
    %c0_i32 = arith.constant 0 : i32
    %c0_i32_0 = arith.constant 0 : i32
    %c0_i32_1 = arith.constant 0 : i32
    return %c0_i32, %c0_i32_0 : i32, i32
  }
  func.func @transform_7(%arg0: i32) -> (i32, i32, i32) {
    %c0_i32 = arith.constant 0 : i32
    %c0_i32_0 = arith.constant 0 : i32
    %c0_i32_1 = arith.constant 0 : i32
    return %arg0, %c0_i32, %c0_i32_0 : i32, i32, i32
  }
}

</mosaic_0001>

<bundles_post_ra>
// kernel: tpu_custom_call.1
= control target key start
LH: loop header
LB: loop body
LE: loop exit
PB: predicated region body
PF: predicated region fallthrough
CT: control target
= control target key end

     0   :  { %s2716_s0 = inlined_call_operand.hbm [shape: f32[2,8,256], index: 0, kind: input, shape index: {}]   ;;  %s2717_s1 = inlined_call_operand.hbm [shape: f32[3,256,256], index: 1, kind: input, shape index: {}]   ;;  %s2718_s2 = inlined_call_operand.hbm [shape: f32[1,256], index: 2, kind: input, shape index: {}]   ;;  %s2719_s3 = inlined_call_operand.hbm [shape: f32[1,256], index: 3, kind: input, shape index: {}]   ;;  %s2720_s4 = inlined_call_operand.hbm [shape: f32[3,256,512], index: 4, kind: input, shape index: {}]   ;;  %s2721_s5 = inlined_call_operand.hbm [shape: f32[1,512], index: 5, kind: input, shape index: {}]   ;;  %s2722_s6 = inlined_call_operand.hbm [shape: f32[1,512], index: 6, kind: input, shape index: {}]   ;;  %s2723_s7 = inlined_call_operand.hbm [shape: f32[2,8,512], index: 7, kind: output, shape index: {}]  }
   0x1   :  { %2724 = sst [smem:[#allocation22_spill]] %s2717_s1 }
   0x2   :  { %2725 = sst [smem:[#allocation23_spill]] %s2718_s2 }
   0x3   :  { %12 = vsyncpa [#allocation5], 0 }
   0x4   :  { %14 = vsyncpa [#allocation5 + $0x1], 0 }
   0x5   :  { %15 = vsyncpa [#allocation8], 0 }
   0x6   :  { %16 = vsyncpa [#allocation11], 0 }
   0x7   :  { %17 = vsyncpa [#allocation14], 0 }
   0x8   :  { %18 = vsyncpa [#allocation6], 0 }
   0x9   :  { %20 = vsyncpa [#allocation6 + $0x1], 0  ;;  %s2479_s24 = smov 0   ;;  %s2481_s25 = smov 0  }
   0xa   :  { %s2483_s26 = smov 0   ;;  %s2485_s27 = smov 0  }
   0xb LB: > { %s2726_s1 = sld [smem:[#allocation22_spill]]  ;;  %s2503_s8 = sadd.s32 4294967295, %s2426_s27   ;;  %s2426_s27 = sphi %s2485_s27, %s2741_s27   ;;  %s2422_s26 = sphi %s2483_s26, %s2740_s26   ;;  %s2418_s25 = sphi %s2481_s25, %s2739_s25   ;;  %s2414_s24 = sphi %s2479_s24, %s2738_s24  }
   0xc   : > { %p1999_p0 = scmp.ge.s32.totalorder %s2426_s27, 1  ;;  %p47_p1 = scmp.eq.s32.totalorder %s2503_s8, 0 }
   0xd   : > { %p209_p2 = scmp.lt.s32.totalorder %s2426_s27, 3  ;;  %s2428_s10 = smov [#allocation7]  }
   0xe   : > { %s222_s11 = sshll.u32 %s2428_s10, 4  ;;  %s247_s14 = sshll.u32 %s2719_s3, 4  ;;  %s223_s11 = int_to_ptr.vmem [resolvable:$true] %s222_s11  ;;  %s248_s14 = int_to_ptr.hbm [resolvable:$true] %s247_s14 }
   0xf   : > { %p2508_p3 = pnand %p1999_p0, %p209_p2  ;;  %s273_s18 = sshll.u32 %s2721_s5, 4  ;;  %s274_s18 = int_to_ptr.hbm [resolvable:$true] %s273_s18 }
  0x10   : > { %s2429_s19 = smov [#allocation10]   ;;  %s2430_s21 = smov 256  }
  0x11   : > { %s220_s30 = sshll.u32 %s2726_s1, 4  ;;  %p2054_p4 = pneg %p2508_p3  ;;  %s221_s30 = int_to_ptr.hbm [resolvable:$true] %s220_s30 }
  0x12   : > { %s249_s20 = sshll.u32 %s2429_s19, 4  ;;  %s2431_s22 = smov 16   ;;  %s250_s20 = int_to_ptr.vmem [resolvable:$true] %s249_s20 }
  0x13   : > { %p2520_p6 = pnand %p2054_p4, %p47_p1  ;;  %s2729_s2 = sld [smem:[#allocation23_spill]] }
  0x14   : > { %s2432_s10 = smov [#allocation13]   ;;  %s2433_s13 = smov [#allocation9]  }
  0x15   : > { %2057 = dma.hbm_to_vmem [thread:$0]  (!%p2520_p6), %s221_s30, 24576, %s223_s11, [#allocation8], %s2430_s21, %s2430_s21, %s2431_s22  }
  0x16   : > { %2063 = dma.hbm_to_vmem [thread:$0]  (!%p2520_p6), %s248_s14, 32, %s250_s20, [#allocation11]  }
  0x17   : > { %s275_s12 = sshll.u32 %s2432_s10, 4  ;;  %s237_s16 = sshll.u32 %s2433_s13, 4  ;;  %s276_s12 = int_to_ptr.vmem [resolvable:$true] %s275_s12  ;;  %s238_s16 = int_to_ptr.vmem [resolvable:$true] %s237_s16 }
  0x18   : > { %2069 = dma.hbm_to_vmem [thread:$0]  (!%p2520_p6), %s274_s18, 64, %s276_s12, [#allocation14]  }
  0x19   : > { %s235_s29 = sshll.u32 %s2729_s2, 4  ;;  %s258_s30 = sshll.u32 %s2720_s4, 4  ;;  %s236_s29 = int_to_ptr.hbm [resolvable:$true] %s235_s29  ;;  %s259_s30 = int_to_ptr.hbm [resolvable:$true] %s258_s30 }
  0x1a   : > { %2060 = dma.hbm_to_vmem [thread:$0]  (!%p2520_p6), %s236_s29, 32, %s238_s16, [#allocation8]  }
  0x1b   : > { %s2434_s11 = smov [#allocation12]   ;;  %s285_s21 = sshll.u32 %s2722_s6, 4  ;;  %s286_s21 = int_to_ptr.hbm [resolvable:$true] %s285_s21 }
  0x1c   : > { %s260_s14 = sshll.u32 %s2434_s11, 4  ;;  %s2435_s22 = smov 512   ;;  %s261_s14 = int_to_ptr.vmem [resolvable:$true] %s260_s14 }
  0x1d   : > { %s2436_s23 = smov 32   ;;  %s2437_s28 = smov [#allocation15]  }
  0x1e   : > { %2066 = dma.hbm_to_vmem [thread:$0]  (!%p2520_p6), %s259_s30, 49152, %s261_s14, [#allocation11], %s2435_s22, %s2435_s22, %s2436_s23  }
  0x1f   : > { %s287_s29 = sshll.u32 %s2437_s28, 4  ;;  %s1998_s10 = sadd.s32 4294967294, %s2426_s27   ;;  %s288_s29 = int_to_ptr.vmem [resolvable:$true] %s287_s29 }
  0x20   : > { %2072 = dma.hbm_to_vmem [thread:$0]  (!%p2520_p6), %s286_s21, 64, %s288_s29, [#allocation14]  }
  0x21   : > { %s2550_s12 = sadd.s32 1, %s2426_s27   ;;  %s33_s16 = sadd.s32 1, %s2422_s26 }
  0x22   : > { %s30_s13 = ssub.s32 %s2426_s27, %s2550_s12  ;;  %p40_p8 = scmp.ne.s32.totalorder %s2422_s26, %s2418_s25 }
  0x23   : > { %p31_p7 = scmp.eq.s32.totalorder %s30_s13, 0  ;;  %p41_p9 = scmp.eq.s32.totalorder %s2426_s27, 0 }
  0x24   : > { %p46_p10 = scmp.ne.s32.totalorder %s2418_s25, %s2414_s24  ;;  %p196_p13 = scmp.eq.s32.totalorder %s2503_s8, 1 }
  0x25   : > { %s2561_s17 = scalar_select %p31_p7, %s2422_s26, %s33_s16  }
  0x26   : > { %p2563_p11 = por %p41_p9, %p40_p8  ;;  %p2569_p12 = por %p47_p1, %p46_p10 }
  0x27   : > { %p202_p0 = scmp.eq.s32.totalorder %s1998_s10, 1  ;;  %p2087_p2 = scmp.lt.s32.totalorder %s2426_s27, 2 }
  0x28   : > { %s298_s30 = sand.u32 1, %s2422_s26   ;;  %p2576_p4 = por %p196_p13, %p40_p8 }
  0x29   : > { %p2580_p6 = por %p202_p0, %p46_p10  ;;  %s2007_s18 = sshll.u32 %s298_s30, 4 }
  0x2a   : > { %s2024_s20 = sshll.u32 %s2426_s27, 4  ;;  %s302_s28 = scalar_lea.vmem [#allocation4], %s2007_s18 }
  0x2b   : > { %s307_s23 = scalar_lea.hbm %s2716_s0, %s2024_s20  ;;  %s311_s29 = sshll.u32 %s302_s28, 4  ;;  %s312_s29 = int_to_ptr.vmem [resolvable:$true] %s311_s29 }
  0x2c   : > { %s309_s13 = sshll.u32 %s307_s23, 4  ;;  %p2590_p7 = pnand %p2087_p2, %p2563_p11  ;;  %s310_s13 = int_to_ptr.hbm [resolvable:$true] %s309_s13 }
  0x2d   : > { %s299_s16 = scalar_lea.sflag [#allocation5], %s298_s30  ;;  %s2318_s1 = sshra.s32 %s310_s13, 4  ;;  %s2319_s1 = int_to_ptr.hbm [resolvable:$true] %s2318_s1 }
  0x2e   : > { %s2320_s2 = scalar_lea.hbm %s2319_s1, 16  ;;  %p2322_p9 = pneg %p2590_p7 }
  0x2f   : > { %p2321_p8 = scmp.ne.s32.totalorder %s2319_s1, %s2320_s2  ;;  %s2325_s21 = scalar_lea.hbm %s2716_s0, 32 }
  0x30   : > { %p2326_p11 = scmp.lt.s32.totalorder %s2319_s1, %s2716_s0  ;;  %p2327_p0 = scmp.lt.s32.totalorder %s2325_s21, %s2320_s2 }
  0x31   : > { %p2323_p10 = pnand %p2322_p9, %p2321_p8 }
  0x32   : > { %p2328_p2 = por %p2327_p0, %p2326_p11 }
  0x33   : > { %p2324_p13 = pneg %p2323_p10 }
  0x35   : > { %p2329_p5 = pnand %p2328_p2, %p2324_p13 }
  0x37   : > { %2332 = shalt.err (!%p2329_p5)
}
  0x38   : > { %2076 = dma.hbm_to_vmem [thread:$0]  (!%p2590_p7), %s310_s13, 256, %s312_s29, %s299_s16  }
  0x39   : > { %320 = sbr.rel (%p2508_p3) target bundleno = 609 (0x261), region = 48  ;;  %s2607_s30 = sand.u32 (!%p2508_p3), 1, %s2418_s25  }
  0x3a   : > { %s2011_s23 = sshll.u32 (!%p2508_p3), %s2607_s30, 4  ;;  %s323_s28 = scalar_lea.sflag (!%p2508_p3), [#allocation5], %s2607_s30 }
  0x3b   : > { %s2611_s18 = scalar_lea.vmem (!%p2508_p3), [#allocation4], %s2011_s23 }
  0x3e   : > { %2393 = dma.done.wait (%p2569_p12), %s323_s28, 256  }
  0x3f   : > { %2395 = vsyncadd (%p2569_p12), %s323_s28, 4294967040 }
  0x40   : > { %2397 = dma.done.wait (%p47_p1), [#allocation8], 24608  }
  0x41   : > { %2399 = vsyncadd (%p47_p1), [#allocation8], 4294942688 }
  0x42   : > { %2401 = dma.done.wait (%p47_p1), [#allocation11], 49184  }
  0x43   : > { %2403 = vsyncadd (%p47_p1), [#allocation11], 4294918112 }
  0x44   : > { %2405 = dma.done.wait (%p47_p1), [#allocation14], 128  }
  0x45   : > { %2407 = vsyncadd (%p47_p1), [#allocation14], 4294967168  ;;  %v515_v0 = vld [vmem:[#allocation7 + $0x2f0] sm:$0xff]  ;;  %v516_v2 = vld [vmem:[#allocation7 + $0x2f8] sm:$0xff]  ;;  %v388_v60 = vlaneseq  ;;  %vm553_vm1 = vcmask 1046528   ;;  %vm795_vm2 = vcmask 1045504  }
  0x46   : > { %v547_v1 = vld [vmem:[#allocation7 + $0x3f0] sm:$0xff]  ;;  %562 = vmatpush.msra.mxu0 %v515_v0  ;;  %v548_v3 = vld [vmem:[#allocation7 + $0x3f8] sm:$0xff]  ;;  %v513_v4 = vld [vmem:[#allocation7 + $0x2e0] sm:$0xff]  ;;  %602 = vmatpush.msra.mxu2 %v516_v2  ;;  %s2018_s1 = sshll.u32 %s2607_s30, 5  ;;  %s2025_s9 = sshll.u32 %s2503_s8, 5 }
  0x47   : > { %582 = vmatpush.msra.mxu1 %v547_v1  ;;  %v545_v5 = vld [vmem:[#allocation7 + $0x3e0] sm:$0xff]  ;;  %622 = vmatpush.msra.mxu3 %v548_v3  ;;  %v514_v6 = vld [vmem:[#allocation7 + $0x2e8] sm:$0xff]  ;;  %v511_v8 = vld [vmem:[#allocation7 + $0x2d0] sm:$0xff]  ;;  %vm2629_vm0 = vcmp.lt.s32.totalorder %v388_v60, 256  ;;  %s2676_s2 = scalar_lea.vmem [#allocation16], %s2018_s1  ;;  %s1866_s13 = scalar_lea.hbm %s2723_s7, %s2025_s9 }
  0x48   : > { %v546_v7 = vld [vmem:[#allocation7 + $0x3e8] sm:$0xff]  ;;  %563 = vmatpush.msra.mxu0 %v513_v4  ;;  %v543_v9 = vld [vmem:[#allocation7 + $0x3d0] sm:$0xff]  ;;  %v512_v10 = vld [vmem:[#allocation7 + $0x2d8] sm:$0xff]  ;;  %603 = vmatpush.msra.mxu2 %v514_v6  ;;  %v2438_v4 = vmov 0.0   ;;  %s1868_s10 = sshll.u32 %s2676_s2, 4  ;;  %s1870_s16 = sshll.u32 %s1866_s13, 4  ;;  %s1869_s10 = int_to_ptr.vmem [resolvable:$true] %s1868_s10  ;;  %s1871_s16 = int_to_ptr.hbm [resolvable:$true] %s1870_s16 }
  0x49   : > { %583 = vmatpush.msra.mxu1 %v545_v5  ;;  %v544_v11 = vld [vmem:[#allocation7 + $0x3d8] sm:$0xff]  ;;  %623 = vmatpush.msra.mxu3 %v546_v7  ;;  %v509_v12 = vld [vmem:[#allocation7 + $0x2c0] sm:$0xff]  ;;  %v510_v14 = vld [vmem:[#allocation7 + $0x2c8] sm:$0xff]  ;;  %392 = vst.msk [vmem:[#allocation2] ss:$8 sm:$0x3] %vm2629_vm0, %v2438_v4 }
  0x4a   : > { %v541_v13 = vld [vmem:[#allocation7 + $0x3c0] sm:$0xff]  ;;  %564 = vmatpush.msra.mxu0 %v511_v8  ;;  %v542_v15 = vld [vmem:[#allocation7 + $0x3c8] sm:$0xff]  ;;  %604 = vmatpush.msra.mxu2 %v512_v10  ;;  %v507_v16 = vld [vmem:[#allocation7 + $0x2b0] sm:$0xff]  ;;  %395 = vst.msk [vmem:[#allocation2 + $0x11] ss:$8 sm:$0x3] %vm2629_vm0, %v2438_v4 }
  0x4b   : > { %584 = vmatpush.msra.mxu1 %v543_v9  ;;  %624 = vmatpush.msra.mxu3 %v544_v11  ;;  %v539_v17 = vld [vmem:[#allocation7 + $0x3b0] sm:$0xff]  ;;  %v508_v18 = vld [vmem:[#allocation7 + $0x2b8] sm:$0xff]  ;;  %v505_v20 = vld [vmem:[#allocation7 + $0x2a0] sm:$0xff]  ;;  %397 = vst.msk [vmem:[#allocation3] ss:$8 sm:$0x3] %vm2629_vm0, %v2438_v4 }
  0x4c   : > { %565 = vmatpush.msra.mxu0 %v509_v12  ;;  %v540_v19 = vld [vmem:[#allocation7 + $0x3b8] sm:$0xff]  ;;  %605 = vmatpush.msra.mxu2 %v510_v14  ;;  %v537_v21 = vld [vmem:[#allocation7 + $0x3a0] sm:$0xff]  ;;  %v506_v22 = vld [vmem:[#allocation7 + $0x2a8] sm:$0xff]  ;;  %400 = vst.msk [vmem:[#allocation3 + $0x11] ss:$8 sm:$0x3] %vm2629_vm0, %v2438_v4 }
  0x4d   : > { %585 = vmatpush.msra.mxu1 %v541_v13  ;;  %625 = vmatpush.msra.mxu3 %v542_v15  ;;  %v538_v23 = vld [vmem:[#allocation7 + $0x3a8] sm:$0xff]  ;;  %v503_v24 = vld [vmem:[#allocation7 + $0x290] sm:$0xff]  ;;  %v504_v26 = vld [vmem:[#allocation7 + $0x298] sm:$0xff]  ;;  %s1855_s8 = scalar_lea.sflag [#allocation6], %s2607_s30  ;;  %s2362_s20 = sshra.s32 %s1871_s16, 4  ;;  %s2363_s20 = int_to_ptr.hbm [resolvable:$true] %s2362_s20 }
  0x4e   : > { %566 = vmatpush.msra.mxu0 %v507_v16  ;;  %606 = vmatpush.msra.mxu2 %v508_v18  ;;  %v535_v25 = vld [vmem:[#allocation7 + $0x390] sm:$0xff]  ;;  %v536_v27 = vld [vmem:[#allocation7 + $0x398] sm:$0xff]  ;;  %v501_v28 = vld [vmem:[#allocation7 + $0x280] sm:$0xff]  ;;  %s2364_s21 = scalar_lea.hbm %s2363_s20, 32  ;;  %s2368_s23 = scalar_lea.hbm %s2723_s7, 64 }
  0x4f   : > { %586 = vmatpush.msra.mxu1 %v539_v17  ;;  %626 = vmatpush.msra.mxu3 %v540_v19  ;;  %v533_v29 = vld [vmem:[#allocation7 + $0x380] sm:$0xff]  ;;  %v502_v30 = vld [vmem:[#allocation7 + $0x288] sm:$0xff]  ;;  %v499_v32 = vld [vmem:[#allocation7 + $0x270] sm:$0xff]  ;;  %p2365_p1 = scmp.ne.s32.totalorder %s2363_s20, %s2364_s21  ;;  %p2369_p12 = scmp.lt.s32.totalorder %s2363_s20, %s2723_s7 }
  0x50   : > { %567 = vmatpush.msra.mxu0 %v505_v20  ;;  %607 = vmatpush.msra.mxu2 %v506_v22  ;;  %v534_v31 = vld [vmem:[#allocation7 + $0x388] sm:$0xff]  ;;  %v531_v33 = vld [vmem:[#allocation7 + $0x370] sm:$0xff]  ;;  %v500_v34 = vld [vmem:[#allocation7 + $0x278] sm:$0xff]  ;;  %p2370_p7 = scmp.lt.s32.totalorder %s2368_s23, %s2364_s21 }
  0x51   : > { %587 = vmatpush.msra.mxu1 %v537_v21  ;;  %627 = vmatpush.msra.mxu3 %v538_v23  ;;  %v532_v35 = vld [vmem:[#allocation7 + $0x378] sm:$0xff]  ;;  %v497_v36 = vld [vmem:[#allocation7 + $0x260] sm:$0xff]  ;;  %v498_v38 = vld [vmem:[#allocation7 + $0x268] sm:$0xff]  ;;  %p2366_p3 = pnand %p2365_p1, %p2576_p4 }
  0x52   : > { %568 = vmatpush.msra.mxu0 %v503_v24  ;;  %608 = vmatpush.msra.mxu2 %v504_v26  ;;  %v529_v37 = vld [vmem:[#allocation7 + $0x360] sm:$0xff]  ;;  %v530_v39 = vld [vmem:[#allocation7 + $0x368] sm:$0xff]  ;;  %v495_v40 = vld [vmem:[#allocation7 + $0x250] sm:$0xff]  ;;  %p2371_p8 = por %p2370_p7, %p2369_p12 }
  0x53   : > { %588 = vmatpush.msra.mxu1 %v535_v25  ;;  %628 = vmatpush.msra.mxu3 %v536_v27  ;;  %v527_v41 = vld [vmem:[#allocation7 + $0x350] sm:$0xff]  ;;  %v496_v42 = vld [vmem:[#allocation7 + $0x258] sm:$0xff]  ;;  %v493_v44 = vld [vmem:[#allocation7 + $0x240] sm:$0xff]  ;;  %p2367_p5 = pneg %p2366_p3 }
  0x54   : > { %569 = vmatpush.msra.mxu0 %v501_v28  ;;  %609 = vmatpush.msra.mxu2 %v502_v30  ;;  %v528_v43 = vld [vmem:[#allocation7 + $0x358] sm:$0xff]  ;;  %v525_v45 = vld [vmem:[#allocation7 + $0x340] sm:$0xff]  ;;  %v494_v46 = vld [vmem:[#allocation7 + $0x248] sm:$0xff] }
  0x55   : > { %589 = vmatpush.msra.mxu1 %v533_v29  ;;  %629 = vmatpush.msra.mxu3 %v534_v31  ;;  %v526_v47 = vld [vmem:[#allocation7 + $0x348] sm:$0xff]  ;;  %v491_v48 = vld [vmem:[#allocation7 + $0x230] sm:$0xff]  ;;  %v492_v50 = vld [vmem:[#allocation7 + $0x238] sm:$0xff]  ;;  %p2372_p9 = pnand %p2371_p8, %p2367_p5 }
  0x56   : > { %570 = vmatpush.msra.mxu0 %v499_v32  ;;  %610 = vmatpush.msra.mxu2 %v500_v34  ;;  %v523_v49 = vld [vmem:[#allocation7 + $0x330] sm:$0xff]  ;;  %v524_v51 = vld [vmem:[#allocation7 + $0x338] sm:$0xff]  ;;  %v489_v52 = vld [vmem:[#allocation7 + $0x220] sm:$0xff] }
  0x57   : > { %590 = vmatpush.msra.mxu1 %v531_v33  ;;  %630 = vmatpush.msra.mxu3 %v532_v35  ;;  %v521_v53 = vld [vmem:[#allocation7 + $0x320] sm:$0xff]  ;;  %v490_v54 = vld [vmem:[#allocation7 + $0x228] sm:$0xff]  ;;  %v487_v56 = vld [vmem:[#allocation7 + $0x210] sm:$0xff] }
  0x58   : > { %571 = vmatpush.msra.mxu0 %v497_v36  ;;  %611 = vmatpush.msra.mxu2 %v498_v38  ;;  %v522_v55 = vld [vmem:[#allocation7 + $0x328] sm:$0xff]  ;;  %v519_v57 = vld [vmem:[#allocation7 + $0x310] sm:$0xff]  ;;  %v488_v58 = vld [vmem:[#allocation7 + $0x218] sm:$0xff] }
  0x59   : > { %591 = vmatpush.msra.mxu1 %v529_v37  ;;  %631 = vmatpush.msra.mxu3 %v530_v39  ;;  %v520_v59 = vld [vmem:[#allocation7 + $0x318] sm:$0xff]  ;;  %v485_v61 = vld [vmem:[#allocation7 + $0x200] sm:$0xff]  ;;  %v486_v63 = vld [vmem:[#allocation7 + $0x208] sm:$0xff] }
  0x5a   : > { %572 = vmatpush.msra.mxu0 %v495_v40  ;;  %612 = vmatpush.msra.mxu2 %v496_v42  ;;  %v517_v62 = vld [vmem:[#allocation7 + $0x300] sm:$0xff]  ;;  %v518_v0 = vld [vmem:[#allocation7 + $0x308] sm:$0xff]  ;;  %v446_v2 = vld [vmem:[#allocation7 + $0xf0] sm:$0xff] }
  0x5b   : > { %592 = vmatpush.msra.mxu1 %v527_v41  ;;  %632 = vmatpush.msra.mxu3 %v528_v43  ;;  %v478_v3 = vld [vmem:[#allocation7 + $0x1f0] sm:$0xff]  ;;  %v447_v5 = vld [vmem:[#allocation7 + $0xf8] sm:$0xff]  ;;  %v444_v7 = vld [vmem:[#allocation7 + $0xe0] sm:$0xff] }
  0x5c   : > { %573 = vmatpush.msra.mxu0 %v493_v44  ;;  %613 = vmatpush.msra.mxu2 %v494_v46  ;;  %v479_v6 = vld [vmem:[#allocation7 + $0x1f8] sm:$0xff]  ;;  %v476_v8 = vld [vmem:[#allocation7 + $0x1e0] sm:$0xff]  ;;  %v445_v9 = vld [vmem:[#allocation7 + $0xe8] sm:$0xff] }
  0x5d   : > { %593 = vmatpush.msra.mxu1 %v525_v45  ;;  %633 = vmatpush.msra.mxu3 %v526_v47  ;;  %v477_v10 = vld [vmem:[#allocation7 + $0x1e8] sm:$0xff]  ;;  %v442_v11 = vld [vmem:[#allocation7 + $0xd0] sm:$0xff]  ;;  %v443_v13 = vld [vmem:[#allocation7 + $0xd8] sm:$0xff] }
  0x5e   : > { %574 = vmatpush.msra.mxu0 %v491_v48  ;;  %614 = vmatpush.msra.mxu2 %v492_v50  ;;  %v474_v12 = vld [vmem:[#allocation7 + $0x1d0] sm:$0xff]  ;;  %v475_v14 = vld [vmem:[#allocation7 + $0x1d8] sm:$0xff]  ;;  %v440_v15 = vld [vmem:[#allocation7 + $0xc0] sm:$0xff] }
  0x5f   : > { %594 = vmatpush.msra.mxu1 %v523_v49  ;;  %634 = vmatpush.msra.mxu3 %v524_v51  ;;  %v472_v16 = vld [vmem:[#allocation7 + $0x1c0] sm:$0xff]  ;;  %v441_v17 = vld [vmem:[#allocation7 + $0xc8] sm:$0xff]  ;;  %v438_v19 = vld [vmem:[#allocation7 + $0xb0] sm:$0xff] }
  0x60   : > { %575 = vmatpush.msra.mxu0 %v489_v52  ;;  %615 = vmatpush.msra.mxu2 %v490_v54  ;;  %v473_v18 = vld [vmem:[#allocation7 + $0x1c8] sm:$0xff]  ;;  %v470_v20 = vld [vmem:[#allocation7 + $0x1b0] sm:$0xff]  ;;  %v439_v22 = vld [vmem:[#allocation7 + $0xb8] sm:$0xff] }
  0x61   : > { %595 = vmatpush.msra.mxu1 %v521_v53  ;;  %635 = vmatpush.msra.mxu3 %v522_v55  ;;  %v402_v21 = vld [vmem:[%s2611_s18] sm:$0xff]  ;;  %v471_v23 = vld [vmem:[#allocation7 + $0x1b8] sm:$0xff]  ;;  %v437_v28 = vld [vmem:[#allocation7 + $0xa8] sm:$0xff] }
  0x62   : > { %576 = vmatpush.msra.mxu0 %v487_v56  ;;  %616 = vmatpush.msra.mxu2 %v488_v58  ;;  %v406_v24 = vrot.slane %v402_v21, 7  ;;  %v436_v25 = vld [vmem:[#allocation7 + $0xa0] sm:$0xff]  ;;  %v403_v27 = vld [vmem:[%s2611_s18 + $0x8] sm:$0xff]  ;;  %v434_v31 = vld [vmem:[#allocation7 + $0x90] sm:$0xff] }
  0x63   : > { %596 = vmatpush.msra.mxu1 %v519_v57  ;;  %636 = vmatpush.msra.mxu3 %v520_v59  ;;  %v468_v26 = vld [vmem:[#allocation7 + $0x1a0] sm:$0xff]  ;;  %v469_v29 = vld [vmem:[#allocation7 + $0x1a8] sm:$0xff]  ;;  %v407_v30 = vrot.slane %v403_v27, 7  ;;  %v466_v32 = vld [vmem:[#allocation7 + $0x190] sm:$0xff] }
  0x64   : > { %577 = vmatpush.msra.mxu0 %v485_v61  ;;  %617 = vmatpush.msra.mxu2 %v486_v63  ;;  %410 = vst [vmem:[#allocation2] sm:$0xfe] %v406_v24  ;;  %v435_v33 = vld [vmem:[#allocation7 + $0x98] sm:$0xff]  ;;  %v432_v35 = vld [vmem:[#allocation7 + $0x80] sm:$0xff]  ;;  %v433_v37 = vld [vmem:[#allocation7 + $0x88] sm:$0xff] }
  0x65   : > { %597 = vmatpush.msra.mxu1 %v517_v62  ;;  %637 = vmatpush.msra.mxu3 %v518_v0  ;;  %412 = vst [vmem:[#allocation2 + $0x10] sm:$0x1] %v406_v24  ;;  %v467_v34 = vld [vmem:[#allocation7 + $0x198] sm:$0xff]  ;;  %v464_v36 = vld [vmem:[#allocation7 + $0x180] sm:$0xff]  ;;  %v465_v38 = vld [vmem:[#allocation7 + $0x188] sm:$0xff] }
  0x66   : > { %642 = vmatpush.msrb.mxu0 %v446_v2  ;;  %682 = vmatpush.msrb.mxu2 %v447_v5  ;;  %411 = vst [vmem:[#allocation2 + $0x8] sm:$0xfe] %v407_v30  ;;  %v430_v39 = vld [vmem:[#allocation7 + $0x70] sm:$0xff]  ;;  %v431_v41 = vld [vmem:[#allocation7 + $0x78] sm:$0xff]  ;;  %v428_v43 = vld [vmem:[#allocation7 + $0x60] sm:$0xff] }
  0x67   : > { %662 = vmatpush.msrb.mxu1 %v478_v3  ;;  %702 = vmatpush.msrb.mxu3 %v479_v6  ;;  %413 = vst [vmem:[#allocation2 + $0x18] sm:$0x1] %v407_v30  ;;  %v462_v40 = vld [vmem:[#allocation7 + $0x170] sm:$0xff]  ;;  %v463_v42 = vld [vmem:[#allocation7 + $0x178] sm:$0xff]  ;;  %v460_v44 = vld [vmem:[#allocation7 + $0x160] sm:$0xff] }
  0x68   : > { %643 = vmatpush.msrb.mxu0 %v444_v7  ;;  %683 = vmatpush.msrb.mxu2 %v445_v9  ;;  %v429_v45 = vld [vmem:[#allocation7 + $0x68] sm:$0xff]  ;;  %v426_v49 = vld [vmem:[#allocation7 + $0x50] sm:$0xff]  ;;  %v427_v51 = vld [vmem:[#allocation7 + $0x58] sm:$0xff] }
  0x69   : > { %663 = vmatpush.msrb.mxu1 %v476_v8  ;;  %703 = vmatpush.msrb.mxu3 %v477_v10  ;;  %v461_v46 = vld [vmem:[#allocation7 + $0x168] sm:$0xff]  ;;  %v458_v50 = vld [vmem:[#allocation7 + $0x150] sm:$0xff]  ;;  %v459_v52 = vld [vmem:[#allocation7 + $0x158] sm:$0xff] }
  0x6a   : > { %644 = vmatpush.msrb.mxu0 %v442_v11  ;;  %684 = vmatpush.msrb.mxu2 %v443_v13  ;;  %v424_v53 = vld [vmem:[#allocation7 + $0x40] sm:$0xff]  ;;  %v425_v59 = vld [vmem:[#allocation7 + $0x48] sm:$0xff]  ;;  %v422_v61 = vld [vmem:[#allocation7 + $0x30] sm:$0xff] }
  0x6b   : > { %664 = vmatpush.msrb.mxu1 %v474_v12  ;;  %704 = vmatpush.msrb.mxu3 %v475_v14  ;;  %v480_v47 = vld [vmem:[#allocation2] sm:$0xfe]  ;;  %v457_v60 = vld [vmem:[#allocation7 + $0x148] sm:$0xff]  ;;  %v454_v62 = vld [vmem:[#allocation7 + $0x130] sm:$0xff] }
  0x6c   : > { %645 = vmatpush.msrb.mxu0 %v440_v15  ;;  %685 = vmatpush.msrb.mxu2 %v441_v17  ;;  %v482_v48 = vld [vmem:[#allocation2 + $0x10] sm:$0x1]  ;;  %v456_v54 = vld [vmem:[#allocation7 + $0x140] sm:$0xff]  ;;  %v554_v55 = vrot.slane %v480_v47, 1  ;;  %v423_v63 = vld [vmem:[#allocation7 + $0x38] sm:$0xff] }
  0x6d   : > { %665 = vmatpush.msrb.mxu1 %v472_v16  ;;  %705 = vmatpush.msrb.mxu3 %v473_v18  ;;  %v555_v56 = vrot.slane %v482_v48, 1  ;;  %v481_v57 = vld [vmem:[#allocation2 + $0x8] sm:$0xfe]  ;;  %v455_v0 = vld [vmem:[#allocation7 + $0x138] sm:$0xff]  ;;  %v420_v4 = vld [vmem:[#allocation7 + $0x20] sm:$0xff] }
  0x6e   : > { %646 = vmatpush.msrb.mxu0 %v438_v19  ;;  %686 = vmatpush.msrb.mxu2 %v439_v22  ;;  %v483_v58 = vld [vmem:[#allocation2 + $0x18] sm:$0x1]  ;;  %v557_v1 = vrot.slane %v481_v57, 1  ;;  %v452_v5 = vld [vmem:[#allocation7 + $0x120] sm:$0xff]  ;;  %v421_v6 = vld [vmem:[#allocation7 + $0x28] sm:$0xff] }
  0x6f   : > { %666 = vmatpush.msrb.mxu1 %v470_v20  ;;  %706 = vmatpush.msrb.mxu3 %v471_v23  ;;  %v558_v2 = vrot.slane %v483_v58, 1  ;;  %v556_v3 = vsel %vm553_vm1, %v554_v55, %v555_v56  ;;  %v453_v7 = vld [vmem:[#allocation7 + $0x128] sm:$0xff]  ;;  %v418_v8 = vld [vmem:[#allocation7 + $0x10] sm:$0xff]  ;;  %v419_v11 = vld [vmem:[#allocation7 + $0x18] sm:$0xff] }
  0x70   : > { %647 = vmatpush.msrb.mxu0 %v436_v25  ;;  %687 = vmatpush.msrb.mxu2 %v437_v28  ;;  %v450_v10 = vld [vmem:[#allocation7 + $0x110] sm:$0xff]  ;;  %v451_v12 = vld [vmem:[#allocation7 + $0x118] sm:$0xff]  ;;  %v416_v13 = vld [vmem:[#allocation7] sm:$0xff] }
  0x71   : > { %667 = vmatpush.msrb.mxu1 %v468_v26  ;;  %707 = vmatpush.msrb.mxu3 %v469_v29  ;;  %v559_v9 = vsel %vm553_vm1, %v557_v1, %v558_v2  ;;  %v448_v14 = vld [vmem:[#allocation7 + $0x100] sm:$0xff]  ;;  %v417_v15 = vld [vmem:[#allocation7 + $0x8] sm:$0xff]  ;;  %v757_v17 = vld [vmem:[#allocation7 + $0x4f0] sm:$0xff] }
  0x72   : > { %648 = vmatpush.msrb.mxu0 %v434_v31  ;;  %688 = vmatpush.msrb.mxu2 %v435_v33  ;;  %v449_v16 = vld [vmem:[#allocation7 + $0x108] sm:$0xff]  ;;  %v789_v18 = vld [vmem:[#allocation7 + $0x5f0] sm:$0xff]  ;;  %v758_v19 = vld [vmem:[#allocation7 + $0x4f8] sm:$0xff] }
  0x73   : > { %668 = vmatpush.msrb.mxu1 %v466_v32  ;;  %708 = vmatpush.msrb.mxu3 %v467_v34  ;;  %v790_v20 = vld [vmem:[#allocation7 + $0x5f8] sm:$0xff]  ;;  %v414_v21 = vld [vmem:[#allocation2] sm:$0xff]  ;;  %v756_v24 = vld [vmem:[#allocation7 + $0x4e8] sm:$0xff] }
  0x74   : > { %649 = vmatpush.msrb.mxu0 %v432_v35  ;;  %689 = vmatpush.msrb.mxu2 %v433_v37  ;;  %v755_v22 = vld [vmem:[#allocation7 + $0x4e0] sm:$0xff]  ;;  %v788_v25 = vld [vmem:[#allocation7 + $0x5e8] sm:$0xff]  ;;  %v753_v26 = vld [vmem:[#allocation7 + $0x4d0] sm:$0xff] }
  0x75   : > { %669 = vmatpush.msrb.mxu1 %v464_v36  ;;  %709 = vmatpush.msrb.mxu3 %v465_v38  ;;  %v787_v23 = vld [vmem:[#allocation7 + $0x5e0] sm:$0xff]  ;;  %v415_v27 = vld [vmem:[#allocation2 + $0x8] sm:$0xff]  ;;  %v785_v28 = vld [vmem:[#allocation7 + $0x5d0] sm:$0xff] }
  0x76   : > { %650 = vmatpush.msrb.mxu0 %v430_v39  ;;  %690 = vmatpush.msrb.mxu2 %v431_v41  ;;  %v754_v29 = vld [vmem:[#allocation7 + $0x4d8] sm:$0xff]  ;;  %v751_v31 = vld [vmem:[#allocation7 + $0x4c0] sm:$0xff]  ;;  %v752_v33 = vld [vmem:[#allocation7 + $0x4c8] sm:$0xff] }
  0x77   : > { %670 = vmatpush.msrb.mxu1 %v462_v40  ;;  %710 = vmatpush.msrb.mxu3 %v463_v42  ;;  %v786_v30 = vld [vmem:[#allocation7 + $0x5d8] sm:$0xff]  ;;  %v783_v32 = vld [vmem:[#allocation7 + $0x5c0] sm:$0xff]  ;;  %v784_v34 = vld [vmem:[#allocation7 + $0x5c8] sm:$0xff] }
  0x78   : > { %651 = vmatpush.msrb.mxu0 %v428_v43  ;;  %691 = vmatpush.msrb.mxu2 %v429_v45  ;;  %v781_v35 = vld [vmem:[#allocation7 + $0x5b0] sm:$0xff]  ;;  %v750_v37 = vld [vmem:[#allocation7 + $0x4b8] sm:$0xff]  ;;  %v747_v39 = vld [vmem:[#allocation7 + $0x4a0] sm:$0xff] }
  0x79   : > { %671 = vmatpush.msrb.mxu1 %v460_v44  ;;  %711 = vmatpush.msrb.mxu3 %v461_v46  ;;  %v749_v36 = vld [vmem:[#allocation7 + $0x4b0] sm:$0xff]  ;;  %v782_v38 = vld [vmem:[#allocation7 + $0x5b8] sm:$0xff]  ;;  %v779_v40 = vld [vmem:[#allocation7 + $0x5a0] sm:$0xff] }
  0x7a   : > { %652 = vmatpush.msrb.mxu0 %v426_v49  ;;  %692 = vmatpush.msrb.mxu2 %v427_v51  ;;  %v748_v41 = vld [vmem:[#allocation7 + $0x4a8] sm:$0xff]  ;;  %v745_v43 = vld [vmem:[#allocation7 + $0x490] sm:$0xff]  ;;  %v746_v45 = vld [vmem:[#allocation7 + $0x498] sm:$0xff] }
  0x7b   : > { %672 = vmatpush.msrb.mxu1 %v458_v50  ;;  %712 = vmatpush.msrb.mxu3 %v459_v52  ;;  %v780_v42 = vld [vmem:[#allocation7 + $0x5a8] sm:$0xff]  ;;  %v777_v44 = vld [vmem:[#allocation7 + $0x590] sm:$0xff]  ;;  %v778_v46 = vld [vmem:[#allocation7 + $0x598] sm:$0xff] }
  0x7c   : > { %653 = vmatpush.msrb.mxu0 %v424_v53  ;;  %693 = vmatpush.msrb.mxu2 %v425_v59  ;;  %v743_v47 = vld [vmem:[#allocation7 + $0x480] sm:$0xff]  ;;  %v744_v49 = vld [vmem:[#allocation7 + $0x488] sm:$0xff]  ;;  %v741_v51 = vld [vmem:[#allocation7 + $0x470] sm:$0xff] }
  0x7d   : > { %673 = vmatpush.msrb.mxu1 %v456_v54  ;;  %713 = vmatpush.msrb.mxu3 %v457_v60  ;;  %v775_v48 = vld [vmem:[#allocation7 + $0x580] sm:$0xff]  ;;  %v776_v50 = vld [vmem:[#allocation7 + $0x588] sm:$0xff]  ;;  %v773_v52 = vld [vmem:[#allocation7 + $0x570] sm:$0xff] }
  0x7e   : > { %654 = vmatpush.msrb.mxu0 %v422_v61  ;;  %694 = vmatpush.msrb.mxu2 %v423_v63  ;;  %v742_v53 = vld [vmem:[#allocation7 + $0x478] sm:$0xff]  ;;  %v739_v55 = vld [vmem:[#allocation7 + $0x460] sm:$0xff]  ;;  %v740_v57 = vld [vmem:[#allocation7 + $0x468] sm:$0xff] }
  0x7f   : > { %674 = vmatpush.msrb.mxu1 %v454_v62  ;;  %714 = vmatpush.msrb.mxu3 %v455_v0  ;;  %v774_v54 = vld [vmem:[#allocation7 + $0x578] sm:$0xff]  ;;  %v771_v56 = vld [vmem:[#allocation7 + $0x560] sm:$0xff]  ;;  %v772_v58 = vld [vmem:[#allocation7 + $0x568] sm:$0xff] }
  0x80   : > { %618 = vmatmul.f32.vlgmr.msra.gmra.mxu2 %v556_v3  ;;  %655 = vmatpush.msrb.mxu0 %v420_v4  ;;  %v737_v59 = vld [vmem:[#allocation7 + $0x450] sm:$0xff]  ;;  %v738_v61 = vld [vmem:[#allocation7 + $0x458] sm:$0xff]  ;;  %v735_v63 = vld [vmem:[#allocation7 + $0x440] sm:$0xff] }
  0x81   : > { %675 = vmatpush.msrb.mxu1 %v452_v5  ;;  %695 = vmatpush.msrb.mxu2 %v421_v6  ;;  %v769_v60 = vld [vmem:[#allocation7 + $0x550] sm:$0xff]  ;;  %v770_v62 = vld [vmem:[#allocation7 + $0x558] sm:$0xff]  ;;  %v767_v0 = vld [vmem:[#allocation7 + $0x540] sm:$0xff] }
  0x82   : > { %715 = vmatpush.msrb.mxu3 %v453_v7  ;;  %656 = vmatpush.msrb.mxu0 %v418_v8  ;;  %v736_v1 = vld [vmem:[#allocation7 + $0x448] sm:$0xff]  ;;  %v765_v4 = vld [vmem:[#allocation7 + $0x530] sm:$0xff]  ;;  %v734_v5 = vld [vmem:[#allocation7 + $0x438] sm:$0xff] }
  0x83   : > { %638 = vmatmul.f32.vlgmr.msra.gmra.mxu3 %v559_v9  ;;  %676 = vmatpush.msrb.mxu1 %v450_v10  ;;  %v768_v2 = vld [vmem:[#allocation7 + $0x548] sm:$0xff]  ;;  %v766_v6 = vld [vmem:[#allocation7 + $0x538] sm:$0xff]  ;;  %v722_v7 = vld [vmem:[#allocation2] sm:$0xfc] }
  0x84   : > { %696 = vmatpush.msrb.mxu2 %v419_v11  ;;  %716 = vmatpush.msrb.mxu3 %v451_v12  ;;  %v724_v8 = vld [vmem:[#allocation2 + $0x10] sm:$0x3]  ;;  %v725_v10 = vld [vmem:[#allocation2 + $0x18] sm:$0x3]  ;;  %v731_v11 = vld [vmem:[#allocation7 + $0x420] sm:$0xff] }
  0x85   : > { %657 = vmatpush.msrb.mxu0 %v416_v13  ;;  %677 = vmatpush.msrb.mxu1 %v448_v14  ;;  %v763_v12 = vld [vmem:[#allocation7 + $0x520] sm:$0xff]  ;;  %v732_v13 = vld [vmem:[#allocation7 + $0x428] sm:$0xff] }
  0x86   : > { %697 = vmatpush.msrb.mxu2 %v417_v15  ;;  %717 = vmatpush.msrb.mxu3 %v449_v16  ;;  %v764_v14 = vld [vmem:[#allocation7 + $0x528] sm:$0xff]  ;;  %v729_v15 = vld [vmem:[#allocation7 + $0x410] sm:$0xff] }
  0x87   : > { %578 = vmatmul.f32.vlgmr.msra.gmra.mxu0 %v556_v3  ;;  %598 = vmatmul.f32.vlgmr.msra.gmra.mxu1 %v559_v9  ;;  %v733_v3 = vld [vmem:[#allocation7 + $0x430] sm:$0xff]  ;;  %v723_v9 = vld [vmem:[#allocation2 + $0x8] sm:$0xfc] }
  0x88   : > { %804 = vmatpush.msra.mxu0 %v757_v17  ;;  %824 = vmatpush.msra.mxu1 %v789_v18  ;;  %v761_v16 = vld [vmem:[#allocation7 + $0x510] sm:$0xff]  ;;  %v796_v17 = vrot.slane %v722_v7, 2  ;;  %v797_v18 = vrot.slane %v724_v8, 2  ;;  %v1061_v7 = vld [vmem:[#allocation12 + $0x460] sm:$0xff] }
  0x89   : > { %844 = vmatpush.msra.mxu2 %v758_v19  ;;  %864 = vmatpush.msra.mxu3 %v790_v20  ;;  %v799_v19 = vrot.slane %v723_v9, 2  ;;  %v800_v20 = vrot.slane %v725_v10, 2  ;;  %v1137_v8 = vld [vmem:[#allocation12 + $0x6c0] sm:$0xff]  ;;  %v1062_v9 = vld [vmem:[#allocation12 + $0x468] sm:$0xff] }
  0x8a   : > { %698 = vmatmul.f32.vlgmr.msrb.gmra.mxu2 %v414_v21  ;;  %805 = vmatpush.msra.mxu0 %v755_v22  ;;  %v762_v22 = vld [vmem:[#allocation7 + $0x518] sm:$0xff]  ;;  %v1138_v10 = vld [vmem:[#allocation12 + $0x6c8] sm:$0xff] }
  0x8b   : > { %825 = vmatpush.msra.mxu1 %v787_v23  ;;  %845 = vmatpush.msra.mxu2 %v756_v24  ;;  %v727_v23 = vld [vmem:[#allocation7 + $0x400] sm:$0xff] }
  0x8c   : > { %865 = vmatpush.msra.mxu3 %v788_v25  ;;  %806 = vmatpush.msra.mxu0 %v753_v26  ;;  %v759_v24 = vld [vmem:[#allocation7 + $0x500] sm:$0xff]  ;;  %v728_v25 = vld [vmem:[#allocation7 + $0x408] sm:$0xff] }
  0x8d   : > { %718 = vmatmul.f32.vlgmr.msrb.gmra.mxu3 %v415_v27  ;;  %826 = vmatpush.msra.mxu1 %v785_v28  ;;  %v760_v26 = vld [vmem:[#allocation7 + $0x508] sm:$0xff]  ;;  %v801_v28 = vsel %vm795_vm2, %v799_v19, %v800_v20 }
  0x8e   : > { %846 = vmatpush.msra.mxu2 %v754_v29  ;;  %866 = vmatpush.msra.mxu3 %v786_v30  ;;  %v1109_v29 = vld [vmem:[#allocation12 + $0x5e0] sm:$0xff]  ;;  %v1110_v30 = vld [vmem:[#allocation12 + $0x5e8] sm:$0xff] }
  0x8f   : > { %807 = vmatpush.msra.mxu0 %v751_v31  ;;  %827 = vmatpush.msra.mxu1 %v783_v32  ;;  %v1173_v31 = vld [vmem:[#allocation12 + $0x7e0] sm:$0xff]  ;;  %v1174_v32 = vld [vmem:[#allocation12 + $0x7e8] sm:$0xff] }
  0x90   : > { %847 = vmatpush.msra.mxu2 %v752_v33  ;;  %867 = vmatpush.msra.mxu3 %v784_v34  ;;  %v1105_v33 = vld [vmem:[#allocation12 + $0x5c0] sm:$0xff]  ;;  %v1106_v34 = vld [vmem:[#allocation12 + $0x5c8] sm:$0xff] }
  0x91   : > { %658 = vmatmul.f32.vlgmr.msrb.gmra.mxu0 %v414_v21  ;;  %828 = vmatpush.msra.mxu1 %v781_v35  ;;  %v730_v21 = vld [vmem:[#allocation7 + $0x418] sm:$0xff]  ;;  %v1101_v35 = vld [vmem:[#allocation12 + $0x5a0] sm:$0xff] }
  0x92   : > { %808 = vmatpush.msra.mxu0 %v749_v36  ;;  %848 = vmatpush.msra.mxu2 %v750_v37  ;;  %v1102_v36 = vld [vmem:[#allocation12 + $0x5a8] sm:$0xff]  ;;  %v1097_v37 = vld [vmem:[#allocation12 + $0x580] sm:$0xff] }
  0x93   : > { %868 = vmatpush.msra.mxu3 %v782_v38  ;;  %678 = vmatmul.f32.vlgmr.msrb.gmra.mxu1 %v415_v27  ;;  %v798_v27 = vsel %vm795_vm2, %v796_v17, %v797_v18  ;;  %v1098_v38 = vld [vmem:[#allocation12 + $0x588] sm:$0xff]  ;;  %v1049_v19 = vld [vmem:[#allocation12 + $0x400] sm:$0xff] }
  0x94   : > { %809 = vmatpush.msra.mxu0 %v747_v39  ;;  %829 = vmatpush.msra.mxu1 %v779_v40  ;;  %v1093_v39 = vld [vmem:[#allocation12 + $0x560] sm:$0xff]  ;;  %v1054_v17 = vld [vmem:[#allocation12 + $0x428] sm:$0xff] }
  0x95   : > { %849 = vmatpush.msra.mxu2 %v748_v41  ;;  %869 = vmatpush.msra.mxu3 %v780_v42  ;;  %v1169_v40 = vld [vmem:[#allocation12 + $0x7c0] sm:$0xff]  ;;  %v1094_v41 = vld [vmem:[#allocation12 + $0x568] sm:$0xff] }
  0x96   : > { %810 = vmatpush.msra.mxu0 %v745_v43  ;;  %830 = vmatpush.msra.mxu1 %v777_v44  ;;  %v1170_v42 = vld [vmem:[#allocation12 + $0x7c8] sm:$0xff]  ;;  %v1089_v43 = vld [vmem:[#allocation12 + $0x540] sm:$0xff] }
  0x97   : > { %850 = vmatpush.msra.mxu2 %v746_v45  ;;  %870 = vmatpush.msra.mxu3 %v778_v46  ;;  %v1165_v44 = vld [vmem:[#allocation12 + $0x7a0] sm:$0xff]  ;;  %v1090_v45 = vld [vmem:[#allocation12 + $0x548] sm:$0xff] }
  0x98   : > { %811 = vmatpush.msra.mxu0 %v743_v47  ;;  %831 = vmatpush.msra.mxu1 %v775_v48  ;;  %v1166_v46 = vld [vmem:[#allocation12 + $0x7a8] sm:$0xff]  ;;  %v1085_v47 = vld [vmem:[#allocation12 + $0x520] sm:$0xff] }
  0x99   : > { %851 = vmatpush.msra.mxu2 %v744_v49  ;;  %871 = vmatpush.msra.mxu3 %v776_v50  ;;  %v1161_v48 = vld [vmem:[#allocation12 + $0x780] sm:$0xff]  ;;  %v1086_v49 = vld [vmem:[#allocation12 + $0x528] sm:$0xff] }
  0x9a   : > { %812 = vmatpush.msra.mxu0 %v741_v51  ;;  %832 = vmatpush.msra.mxu1 %v773_v52  ;;  %v1162_v50 = vld [vmem:[#allocation12 + $0x788] sm:$0xff]  ;;  %v1081_v51 = vld [vmem:[#allocation12 + $0x500] sm:$0xff] }
  0x9b   : > { %852 = vmatpush.msra.mxu2 %v742_v53  ;;  %872 = vmatpush.msra.mxu3 %v774_v54  ;;  %v1157_v52 = vld [vmem:[#allocation12 + $0x760] sm:$0xff]  ;;  %v1082_v53 = vld [vmem:[#allocation12 + $0x508] sm:$0xff] }
  0x9c   : > { %813 = vmatpush.msra.mxu0 %v739_v55  ;;  %833 = vmatpush.msra.mxu1 %v771_v56  ;;  %v1158_v54 = vld [vmem:[#allocation12 + $0x768] sm:$0xff]  ;;  %v1077_v55 = vld [vmem:[#allocation12 + $0x4e0] sm:$0xff] }
  0x9d   : > { %853 = vmatpush.msra.mxu2 %v740_v57  ;;  %873 = vmatpush.msra.mxu3 %v772_v58  ;;  %v1153_v56 = vld [vmem:[#allocation12 + $0x740] sm:$0xff]  ;;  %v1078_v57 = vld [vmem:[#allocation12 + $0x4e8] sm:$0xff] }
  0x9e   : > { %814 = vmatpush.msra.mxu0 %v737_v59  ;;  %834 = vmatpush.msra.mxu1 %v769_v60  ;;  %v1154_v58 = vld [vmem:[#allocation12 + $0x748] sm:$0xff]  ;;  %v1073_v59 = vld [vmem:[#allocation12 + $0x4c0] sm:$0xff] }
  0x9f   : > { %854 = vmatpush.msra.mxu2 %v738_v61  ;;  %874 = vmatpush.msra.mxu3 %v770_v62  ;;  %v1149_v60 = vld [vmem:[#allocation12 + $0x720] sm:$0xff]  ;;  %v1074_v61 = vld [vmem:[#allocation12 + $0x4c8] sm:$0xff] }
  0xa0   : > { %815 = vmatpush.msra.mxu0 %v735_v63  ;;  %835 = vmatpush.msra.mxu1 %v767_v0  ;;  %v1150_v62 = vld [vmem:[#allocation12 + $0x728] sm:$0xff]  ;;  %v1069_v63 = vld [vmem:[#allocation12 + $0x4a0] sm:$0xff] }
  0xa1   : > { %855 = vmatpush.msra.mxu2 %v736_v1  ;;  %875 = vmatpush.msra.mxu3 %v768_v2  ;;  %v1145_v0 = vld [vmem:[#allocation12 + $0x700] sm:$0xff]  ;;  %v1070_v1 = vld [vmem:[#allocation12 + $0x4a8] sm:$0xff] }
  0xa2   : > { %816 = vmatpush.msra.mxu0 %v733_v3  ;;  %836 = vmatpush.msra.mxu1 %v765_v4  ;;  %v1146_v2 = vld [vmem:[#allocation12 + $0x708] sm:$0xff]  ;;  %v1065_v3 = vld [vmem:[#allocation12 + $0x480] sm:$0xff] }
  0xa3   : > { %856 = vmatpush.msra.mxu2 %v734_v5  ;;  %876 = vmatpush.msra.mxu3 %v766_v6  ;;  %v1141_v4 = vld [vmem:[#allocation12 + $0x6e0] sm:$0xff]  ;;  %v1066_v5 = vld [vmem:[#allocation12 + $0x488] sm:$0xff] }
  0xa4   : > { %817 = vmatpush.msra.mxu0 %v731_v11  ;;  %837 = vmatpush.msra.mxu1 %v763_v12  ;;  %v1142_v6 = vld [vmem:[#allocation12 + $0x6e8] sm:$0xff]  ;;  %v1057_v11 = vld [vmem:[#allocation12 + $0x440] sm:$0xff] }
  0xa5   : > { %857 = vmatpush.msra.mxu2 %v732_v13  ;;  %877 = vmatpush.msra.mxu3 %v764_v14  ;;  %v1133_v12 = vld [vmem:[#allocation12 + $0x6a0] sm:$0xff]  ;;  %v1058_v13 = vld [vmem:[#allocation12 + $0x448] sm:$0xff] }
  0xa6   : > { %818 = vmatpush.msra.mxu0 %v729_v15  ;;  %838 = vmatpush.msra.mxu1 %v761_v16  ;;  %v1134_v14 = vld [vmem:[#allocation12 + $0x6a8] sm:$0xff]  ;;  %v1053_v15 = vld [vmem:[#allocation12 + $0x420] sm:$0xff] }
  0xa7   : > { %858 = vmatpush.msra.mxu2 %v730_v21  ;;  %878 = vmatpush.msra.mxu3 %v762_v22  ;;  %v1129_v16 = vld [vmem:[#allocation12 + $0x680] sm:$0xff]  ;;  %v1130_v18 = vld [vmem:[#allocation12 + $0x688] sm:$0xff] }
  0xa8   : > { %819 = vmatpush.msra.mxu0 %v727_v23  ;;  %839 = vmatpush.msra.mxu1 %v759_v24  ;;  %v1125_v20 = vld [vmem:[#allocation12 + $0x660] sm:$0xff]  ;;  %v1050_v21 = vld [vmem:[#allocation12 + $0x408] sm:$0xff]  ;;  %v1111_v23 = vld [vmem:[#allocation12 + $0x5f0] sm:$0xff] }
  0xa9   : > { %859 = vmatpush.msra.mxu2 %v728_v25  ;;  %879 = vmatpush.msra.mxu3 %v760_v26  ;;  %v1126_v22 = vld [vmem:[#allocation12 + $0x668] sm:$0xff]  ;;  %v1112_v24 = vld [vmem:[#allocation12 + $0x5f8] sm:$0xff]  ;;  %v1121_v25 = vld [vmem:[#allocation12 + $0x640] sm:$0xff] }
  0xaa   : > { %820 = vmatmul.f32.vlgmr.msra.gmra.mxu0 %v798_v27  ;;  %840 = vmatmul.f32.vlgmr.msra.gmra.mxu1 %v801_v28  ;;  %v1122_v26 = vld [vmem:[#allocation12 + $0x648] sm:$0xff] }
  0xab   : > { %860 = vmatmul.f32.vlgmr.msra.gmra.mxu2 %v798_v27  ;;  %880 = vmatmul.f32.vlgmr.msra.gmra.mxu3 %v801_v28  ;;  %v1107_v27 = vld [vmem:[#allocation12 + $0x5d0] sm:$0xff]  ;;  %v1108_v28 = vld [vmem:[#allocation12 + $0x5d8] sm:$0xff] }
  0xac   : > { %1189 = vmatpush.msrb.mxu0 %v1109_v29  ;;  %1229 = vmatpush.msrb.mxu2 %v1110_v30  ;;  %v1117_v29 = vld [vmem:[#allocation12 + $0x620] sm:$0xff]  ;;  %v1118_v30 = vld [vmem:[#allocation12 + $0x628] sm:$0xff] }
  0xad   : > { %1209 = vmatpush.msrb.mxu1 %v1173_v31  ;;  %1249 = vmatpush.msrb.mxu3 %v1174_v32  ;;  %v1103_v31 = vld [vmem:[#allocation12 + $0x5b0] sm:$0xff]  ;;  %v1104_v32 = vld [vmem:[#allocation12 + $0x5b8] sm:$0xff] }
  0xae   : > { %1190 = vmatpush.msrb.mxu0 %v1105_v33  ;;  %1230 = vmatpush.msrb.mxu2 %v1106_v34  ;;  %v1113_v33 = vld [vmem:[#allocation12 + $0x600] sm:$0xff]  ;;  %v1114_v34 = vld [vmem:[#allocation12 + $0x608] sm:$0xff] }
  0xaf   : > { %1210 = vmatpush.msrb.mxu1 %v1169_v40  ;;  %1250 = vmatpush.msrb.mxu3 %v1170_v42  ;;  %v1171_v40 = vld [vmem:[#allocation12 + $0x7d0] sm:$0xff]  ;;  %v1172_v42 = vld [vmem:[#allocation12 + $0x7d8] sm:$0xff] }
  0xb0   : > { %1191 = vmatpush.msrb.mxu0 %v1101_v35  ;;  %1231 = vmatpush.msrb.mxu2 %v1102_v36  ;;  %v1099_v35 = vld [vmem:[#allocation12 + $0x590] sm:$0xff] }
  0xb1   : > { %1211 = vmatpush.msrb.mxu1 %v1165_v44  ;;  %1251 = vmatpush.msrb.mxu3 %v1166_v46  ;;  %v1175_v36 = vld [vmem:[#allocation12 + $0x7f0] sm:$0xff]  ;;  %v1168_v46 = vld [vmem:[#allocation12 + $0x7b8] sm:$0xff] }
  0xb2   : > { %1192 = vmatpush.msrb.mxu0 %v1097_v37  ;;  %1232 = vmatpush.msrb.mxu2 %v1098_v38  ;;  %v1100_v37 = vld [vmem:[#allocation12 + $0x598] sm:$0xff]  ;;  %v1167_v44 = vld [vmem:[#allocation12 + $0x7b0] sm:$0xff] }
  0xb3   : > { %1212 = vmatpush.msrb.mxu1 %v1161_v48  ;;  %1252 = vmatpush.msrb.mxu3 %v1162_v50  ;;  %v1176_v38 = vld [vmem:[#allocation12 + $0x7f8] sm:$0xff]  ;;  %v1163_v48 = vld [vmem:[#allocation12 + $0x790] sm:$0xff] }
  0xb4   : > { %1193 = vmatpush.msrb.mxu0 %v1093_v39  ;;  %1233 = vmatpush.msrb.mxu2 %v1094_v41  ;;  %v1095_v39 = vld [vmem:[#allocation12 + $0x570] sm:$0xff]  ;;  %v1096_v41 = vld [vmem:[#allocation12 + $0x578] sm:$0xff] }
  0xb5   : > { %1213 = vmatpush.msrb.mxu1 %v1157_v52  ;;  %1253 = vmatpush.msrb.mxu3 %v1158_v54  ;;  %v1164_v50 = vld [vmem:[#allocation12 + $0x798] sm:$0xff]  ;;  %v1159_v52 = vld [vmem:[#allocation12 + $0x770] sm:$0xff] }
  0xb6   : > { %1194 = vmatpush.msrb.mxu0 %v1089_v43  ;;  %1234 = vmatpush.msrb.mxu2 %v1090_v45  ;;  %v1091_v43 = vld [vmem:[#allocation12 + $0x550] sm:$0xff]  ;;  %v1092_v45 = vld [vmem:[#allocation12 + $0x558] sm:$0xff] }
  0xb7   : > { %1214 = vmatpush.msrb.mxu1 %v1153_v56  ;;  %1254 = vmatpush.msrb.mxu3 %v1154_v58  ;;  %v1160_v54 = vld [vmem:[#allocation12 + $0x778] sm:$0xff]  ;;  %v1155_v56 = vld [vmem:[#allocation12 + $0x750] sm:$0xff] }
  0xb8   : > { %1195 = vmatpush.msrb.mxu0 %v1085_v47  ;;  %1235 = vmatpush.msrb.mxu2 %v1086_v49  ;;  %v1087_v47 = vld [vmem:[#allocation12 + $0x530] sm:$0xff]  ;;  %v1088_v49 = vld [vmem:[#allocation12 + $0x538] sm:$0xff] }
  0xb9   : > { %1215 = vmatpush.msrb.mxu1 %v1149_v60  ;;  %1255 = vmatpush.msrb.mxu3 %v1150_v62  ;;  %v1156_v58 = vld [vmem:[#allocation12 + $0x758] sm:$0xff]  ;;  %v1151_v60 = vld [vmem:[#allocation12 + $0x730] sm:$0xff] }
  0xba   : > { %1196 = vmatpush.msrb.mxu0 %v1081_v51  ;;  %1236 = vmatpush.msrb.mxu2 %v1082_v53  ;;  %v1083_v51 = vld [vmem:[#allocation12 + $0x510] sm:$0xff]  ;;  %v1084_v53 = vld [vmem:[#allocation12 + $0x518] sm:$0xff] }
  0xbb   : > { %1216 = vmatpush.msrb.mxu1 %v1145_v0  ;;  %1256 = vmatpush.msrb.mxu3 %v1146_v2  ;;  %v1152_v62 = vld [vmem:[#allocation12 + $0x738] sm:$0xff]  ;;  %v1147_v2 = vld [vmem:[#allocation12 + $0x710] sm:$0xff] }
  0xbc   : > { %1197 = vmatpush.msrb.mxu0 %v1077_v55  ;;  %1237 = vmatpush.msrb.mxu2 %v1078_v57  ;;  %v1079_v55 = vld [vmem:[#allocation12 + $0x4f0] sm:$0xff]  ;;  %v1080_v57 = vld [vmem:[#allocation12 + $0x4f8] sm:$0xff] }
  0xbd   : > { %1217 = vmatpush.msrb.mxu1 %v1141_v4  ;;  %1257 = vmatpush.msrb.mxu3 %v1142_v6  ;;  %v1148_v4 = vld [vmem:[#allocation12 + $0x718] sm:$0xff]  ;;  %v1143_v6 = vld [vmem:[#allocation12 + $0x6f0] sm:$0xff] }
  0xbe   : > { %1198 = vmatpush.msrb.mxu0 %v1073_v59  ;;  %1238 = vmatpush.msrb.mxu2 %v1074_v61  ;;  %v1075_v59 = vld [vmem:[#allocation12 + $0x4d0] sm:$0xff]  ;;  %v1076_v61 = vld [vmem:[#allocation12 + $0x4d8] sm:$0xff] }
  0xbf   : > { %1218 = vmatpush.msrb.mxu1 %v1137_v8  ;;  %1258 = vmatpush.msrb.mxu3 %v1138_v10  ;;  %v1144_v8 = vld [vmem:[#allocation12 + $0x6f8] sm:$0xff]  ;;  %v1139_v10 = vld [vmem:[#allocation12 + $0x6d0] sm:$0xff] }
  0xc0   : > { %1199 = vmatpush.msrb.mxu0 %v1069_v63  ;;  %1239 = vmatpush.msrb.mxu2 %v1070_v1  ;;  %v1071_v1 = vld [vmem:[#allocation12 + $0x4b0] sm:$0xff] }
  0xc1   : > { %1219 = vmatpush.msrb.mxu1 %v1133_v12  ;;  %1259 = vmatpush.msrb.mxu3 %v1134_v14  ;;  %v1140_v12 = vld [vmem:[#allocation12 + $0x6d8] sm:$0xff]  ;;  %v1135_v14 = vld [vmem:[#allocation12 + $0x6b0] sm:$0xff] }
  0xc2   : > { %1200 = vmatpush.msrb.mxu0 %v1065_v3  ;;  %1240 = vmatpush.msrb.mxu2 %v1066_v5  ;;  %v1072_v3 = vld [vmem:[#allocation12 + $0x4b8] sm:$0xff]  ;;  %v1067_v5 = vld [vmem:[#allocation12 + $0x490] sm:$0xff] }
  0xc3   : > { %1220 = vmatpush.msrb.mxu1 %v1129_v16  ;;  %1260 = vmatpush.msrb.mxu3 %v1130_v18  ;;  %v1136_v18 = vld [vmem:[#allocation12 + $0x6b8] sm:$0xff] }
  0xc4   : > { %1201 = vmatpush.msrb.mxu0 %v1061_v7  ;;  %1241 = vmatpush.msrb.mxu2 %v1062_v9  ;;  %v1068_v7 = vld [vmem:[#allocation12 + $0x498] sm:$0xff]  ;;  %v1063_v9 = vld [vmem:[#allocation12 + $0x470] sm:$0xff] }
  0xc5   : > { %1221 = vmatpush.msrb.mxu1 %v1125_v20  ;;  %1261 = vmatpush.msrb.mxu3 %v1126_v22  ;;  %v1131_v20 = vld [vmem:[#allocation12 + $0x690] sm:$0xff]  ;;  %v1132_v22 = vld [vmem:[#allocation12 + $0x698] sm:$0xff] }
  0xc6   : > { %1202 = vmatpush.msrb.mxu0 %v1057_v11  ;;  %1242 = vmatpush.msrb.mxu2 %v1058_v13  ;;  %v1064_v11 = vld [vmem:[#allocation12 + $0x478] sm:$0xff]  ;;  %v1059_v13 = vld [vmem:[#allocation12 + $0x450] sm:$0xff] }
  0xc7   : > { %1222 = vmatpush.msrb.mxu1 %v1121_v25  ;;  %1262 = vmatpush.msrb.mxu3 %v1122_v26  ;;  %v1052_v25 = vld [vmem:[#allocation12 + $0x418] sm:$0xff] }
  0xc8   : > { %1203 = vmatpush.msrb.mxu0 %v1053_v15  ;;  %1243 = vmatpush.msrb.mxu2 %v1054_v17  ;;  %v1060_v15 = vld [vmem:[#allocation12 + $0x458] sm:$0xff] }
  0xc9   : > { %1223 = vmatpush.msrb.mxu1 %v1117_v29  ;;  %1263 = vmatpush.msrb.mxu3 %v1118_v30  ;;  %v1128_v26 = vld [vmem:[#allocation12 + $0x678] sm:$0xff]  ;;  %v1123_v30 = vld [vmem:[#allocation12 + $0x650] sm:$0xff] }
  0xca   : > { %1204 = vmatpush.msrb.mxu0 %v1049_v19  ;;  %1244 = vmatpush.msrb.mxu2 %v1050_v21  ;;  %v1055_v19 = vld [vmem:[#allocation12 + $0x430] sm:$0xff]  ;;  %v1056_v21 = vld [vmem:[#allocation12 + $0x438] sm:$0xff] }
  0xcb   : > { %1224 = vmatpush.msrb.mxu1 %v1113_v33  ;;  %1264 = vmatpush.msrb.mxu3 %v1114_v34  ;;  %v1120_v33 = vld [vmem:[#allocation12 + $0x638] sm:$0xff] }
  0xcc   : > { %1269 = vmatpush.msra.mxu0 %v1111_v23  ;;  %1309 = vmatpush.msra.mxu2 %v1112_v24  ;;  %v1051_v23 = vld [vmem:[#allocation12 + $0x410] sm:$0xff] }
  0xcd   : > { %1289 = vmatpush.msra.mxu1 %v1175_v36  ;;  %1329 = vmatpush.msra.mxu3 %v1176_v38  ;;  %v1127_v24 = vld [vmem:[#allocation12 + $0x670] sm:$0xff] }
  0xce   : > { %1270 = vmatpush.msra.mxu0 %v1107_v27  ;;  %1310 = vmatpush.msra.mxu2 %v1108_v28  ;;  %v1115_v36 = vld [vmem:[#allocation12 + $0x610] sm:$0xff] }
  0xcf   : > { %1290 = vmatpush.msra.mxu1 %v1171_v40  ;;  %1330 = vmatpush.msra.mxu3 %v1172_v42 }
  0xd0   : > { %1271 = vmatpush.msra.mxu0 %v1103_v31  ;;  %1311 = vmatpush.msra.mxu2 %v1104_v32  ;;  %v1124_v31 = vld [vmem:[#allocation12 + $0x658] sm:$0xff]  ;;  %v1119_v32 = vld [vmem:[#allocation12 + $0x630] sm:$0xff] }
  0xd1   : > { %1291 = vmatpush.msra.mxu1 %v1167_v44  ;;  %1331 = vmatpush.msra.mxu3 %v1168_v46 }
  0xd2   : > { %1272 = vmatpush.msra.mxu0 %v1099_v35  ;;  %1312 = vmatpush.msra.mxu2 %v1100_v37  ;;  %v886_v35 = vld [vmem:[#allocation9] sm:$0x3] }
  0xd3   : > { %1292 = vmatpush.msra.mxu1 %v1163_v48  ;;  %1332 = vmatpush.msra.mxu3 %v1164_v50  ;;  %v1116_v37 = vld [vmem:[#allocation12 + $0x618] sm:$0xff]  ;;  %v888_v46 = vperm.slane %v886_v35, 0 }
  0xd4   : > { %1273 = vmatpush.msra.mxu0 %v1095_v39  ;;  %1313 = vmatpush.msra.mxu2 %v1096_v41 }
  0xd5   : > { %1293 = vmatpush.msra.mxu1 %v1159_v52  ;;  %1333 = vmatpush.msra.mxu3 %v1160_v54 }
  0xd6   : > { %1274 = vmatpush.msra.mxu0 %v1091_v43  ;;  %1314 = vmatpush.msra.mxu2 %v1092_v45  ;;  %v894_v43 = vld [vmem:[#allocation10] sm:$0x3] }
  0xd7   : > { %1294 = vmatpush.msra.mxu1 %v1155_v56  ;;  %1334 = vmatpush.msra.mxu3 %v1156_v58  ;;  %v896_v48 = vperm.slane %v894_v43, 0  ;;  %v889_v56 = vperm.slane %v886_v35, 1  ;;  %v949_v35 = vld [vmem:[#allocation12 + $0x108] sm:$0xff] }
  0xd8   : > { %1275 = vmatpush.msra.mxu0 %v1087_v47  ;;  %1315 = vmatpush.msra.mxu2 %v1088_v49 }
  0xd9   : > { %1295 = vmatpush.msra.mxu1 %v1151_v60  ;;  %1335 = vmatpush.msra.mxu3 %v1152_v62 }
  0xda   : > { %1276 = vmatpush.msra.mxu0 %v1083_v51  ;;  %1316 = vmatpush.msra.mxu2 %v1084_v53 }
  0xdb   : > { %1296 = vmatpush.msra.mxu1 %v1147_v2  ;;  %1336 = vmatpush.msra.mxu3 %v1148_v4 }
  0xdc   : > { %1277 = vmatpush.msra.mxu0 %v1079_v55  ;;  %1317 = vmatpush.msra.mxu2 %v1080_v57 }
  0xdd   : > { %1297 = vmatpush.msra.mxu1 %v1143_v6  ;;  %1337 = vmatpush.msra.mxu3 %v1144_v8  ;;  %v977_v6 = vld [vmem:[#allocation12 + $0x1e8] sm:$0xff]  ;;  %v972_v8 = vld [vmem:[#allocation12 + $0x1c0] sm:$0xff] }
  0xde   : > { %1278 = vmatpush.msra.mxu0 %v1075_v59  ;;  %1318 = vmatpush.msra.mxu2 %v1076_v61  ;;  %v897_v59 = vperm.slane %v894_v43, 1  ;;  %v941_v43 = vld [vmem:[#allocation12 + $0xc8] sm:$0xff] }
  0xdf   : > { %1298 = vmatpush.msra.mxu1 %v1139_v10  ;;  %1338 = vmatpush.msra.mxu3 %v1140_v12  ;;  %v968_v10 = vld [vmem:[#allocation12 + $0x1a0] sm:$0xff] }
  0xe0   : > { %1279 = vmatpush.msra.mxu0 %v1071_v1  ;;  %1319 = vmatpush.msra.mxu2 %v1072_v3 }
  0xe1   : > { %1299 = vmatpush.msra.mxu1 %v1135_v14  ;;  %1339 = vmatpush.msra.mxu3 %v1136_v18 }
  0xe2   : > { %1280 = vmatpush.msra.mxu0 %v1067_v5  ;;  %1320 = vmatpush.msra.mxu2 %v1068_v7  ;;  %v976_v5 = vld [vmem:[#allocation12 + $0x1e0] sm:$0xff] }
  0xe3   : > { %1300 = vmatpush.msra.mxu1 %v1131_v20  ;;  %1340 = vmatpush.msra.mxu3 %v1132_v22  ;;  %v1041_v20 = vld [vmem:[#allocation12 + $0x3e8] sm:$0xff]  ;;  %v1036_v22 = vld [vmem:[#allocation12 + $0x3c0] sm:$0xff] }
  0xe4   : > { %1281 = vmatpush.msra.mxu0 %v1063_v9  ;;  %1321 = vmatpush.msra.mxu2 %v1064_v11  ;;  %v973_v9 = vld [vmem:[#allocation12 + $0x1c8] sm:$0xff] }
  0xe5   : > { %1301 = vmatpush.msra.mxu1 %v1127_v24  ;;  %1341 = vmatpush.msra.mxu3 %v1128_v26  ;;  %v969_v11 = vld [vmem:[#allocation12 + $0x1a8] sm:$0xff]  ;;  %v1032_v26 = vld [vmem:[#allocation12 + $0x3a0] sm:$0xff] }
  0xe6   : > { %1282 = vmatpush.msra.mxu0 %v1059_v13  ;;  %1322 = vmatpush.msra.mxu2 %v1060_v15  ;;  %v1037_v24 = vld [vmem:[#allocation12 + $0x3c8] sm:$0xff] }
  0xe7   : > { %1302 = vmatpush.msra.mxu1 %v1123_v30  ;;  %1342 = vmatpush.msra.mxu3 %v1124_v31  ;;  %v1028_v30 = vld [vmem:[#allocation12 + $0x380] sm:$0xff]  ;;  %v953_v31 = vld [vmem:[#allocation12 + $0x128] sm:$0xff] }
  0xe8   : > { %1283 = vmatpush.msra.mxu0 %v1055_v19  ;;  %1323 = vmatpush.msra.mxu2 %v1056_v21  ;;  %v965_v19 = vld [vmem:[#allocation12 + $0x188] sm:$0xff]  ;;  %v960_v21 = vld [vmem:[#allocation12 + $0x160] sm:$0xff] }
  0xe9   : > { %1303 = vmatpush.msra.mxu1 %v1119_v32  ;;  %1343 = vmatpush.msra.mxu3 %v1120_v33  ;;  %v1029_v32 = vld [vmem:[#allocation12 + $0x388] sm:$0xff]  ;;  %v948_v33 = vld [vmem:[#allocation12 + $0x100] sm:$0xff] }
  0xea   : > { %1284 = vmatpush.msra.mxu0 %v1051_v23  ;;  %1324 = vmatpush.msra.mxu2 %v1052_v25  ;;  %v961_v23 = vld [vmem:[#allocation12 + $0x168] sm:$0xff]  ;;  %v956_v25 = vld [vmem:[#allocation12 + $0x140] sm:$0xff] }
  0xeb   : > { %1304 = vmatpush.msra.mxu1 %v1115_v36  ;;  %1344 = vmatpush.msra.mxu3 %v1116_v37  ;;  %v1025_v36 = vld [vmem:[#allocation12 + $0x368] sm:$0xff]  ;;  %v944_v37 = vld [vmem:[#allocation12 + $0xe0] sm:$0xff] }
 0x103   : > { %v619_v16 = vpop.f32.mrf.mxu2 }
 0x104   : > { %v579_v63 = vpop.f32.mrf.mxu0  ;;  %v599_v0 = vpop.f32.mrf.mxu1 }
 0x105   : > { %v600_v29 = vadd.f32 %v599_v0, %v579_v63 }
 0x106   : > { %v639_v17 = vpop.f32.mrf.mxu3 }
 0x107   : > { %v640_v40 = vadd.f32 %v639_v17, %v619_v16  ;;  %v964_v16 = vld [vmem:[#allocation12 + $0x180] sm:$0xff] }
 0x108   : > { %v1040_v17 = vld [vmem:[#allocation12 + $0x3e0] sm:$0xff] }
 0x10d   : > { %v699_v38 = vpop.f32.mrf.mxu2 }
 0x10e   : > { %v659_v27 = vpop.f32.mrf.mxu0  ;;  %v700_v49 = vadd.f32 %v699_v38, %v640_v40  ;;  %v1020_v38 = vld [vmem:[#allocation12 + $0x340] sm:$0xff]  ;;  %v1021_v40 = vld [vmem:[#allocation12 + $0x348] sm:$0xff] }
 0x10f   : > { %v660_v34 = vadd.f32 %v659_v27, %v600_v29  ;;  %v957_v27 = vld [vmem:[#allocation12 + $0x148] sm:$0xff]  ;;  %v952_v29 = vld [vmem:[#allocation12 + $0x120] sm:$0xff] }
 0x110   : > { %v679_v28 = vpop.f32.mrf.mxu1  ;;  %v719_v39 = vpop.f32.mrf.mxu3 }
 0x111   : > { %v680_v44 = vadd.f32 %v679_v28, %v660_v34  ;;  %v720_v54 = vadd.f32 %v719_v39, %v700_v49  ;;  %v1033_v28 = vld [vmem:[#allocation12 + $0x3a8] sm:$0xff]  ;;  %v1024_v34 = vld [vmem:[#allocation12 + $0x360] sm:$0xff] }
 0x112   : > { %v945_v39 = vld [vmem:[#allocation12 + $0xe8] sm:$0xff]  ;;  %v932_v49 = vld [vmem:[#allocation12 + $0x80] sm:$0xff] }
 0x127   : > { %v821_v41 = vpop.f32.mrf.mxu0  ;;  %v841_v42 = vpop.f32.mrf.mxu1 }
 0x128   : > { %v842_v45 = vadd.f32 %v841_v42, %v821_v41  ;;  %v940_v41 = vld [vmem:[#allocation12 + $0xc0] sm:$0xff] }
 0x129   : > { %v1016_v42 = vld [vmem:[#allocation12 + $0x320] sm:$0xff] }
 0x12a   : > { %v884_v47 = vadd.f32 %v842_v45, %v680_v44  ;;  %v1017_v44 = vld [vmem:[#allocation12 + $0x328] sm:$0xff]  ;;  %v936_v45 = vld [vmem:[#allocation12 + $0xa0] sm:$0xff] }
 0x12c   : > { %v892_v50 = vmul.f32 %v888_v46, %v884_v47  ;;  %v1012_v46 = vld [vmem:[#allocation12 + $0x300] sm:$0xff]  ;;  %v937_v47 = vld [vmem:[#allocation12 + $0xa8] sm:$0xff] }
 0x12e   : > { %v900_v51 = vadd.f32 %v896_v48, %v892_v50  ;;  %v861_v52 = vpop.f32.mrf.mxu2  ;;  %v881_v53 = vpop.f32.mrf.mxu3  ;;  %v1013_v48 = vld [vmem:[#allocation12 + $0x308] sm:$0xff]  ;;  %v1008_v50 = vld [vmem:[#allocation12 + $0x2e0] sm:$0xff] }
 0x12f   : > { %v882_v55 = vadd.f32 %v881_v53, %v861_v52  ;;  %v1009_v52 = vld [vmem:[#allocation12 + $0x2e8] sm:$0xff]  ;;  %v928_v53 = vld [vmem:[#allocation12 + $0x60] sm:$0xff] }
 0x130   : > { %v902_v57 = vmax.f32 %v900_v51, 0.0  ;;  %v933_v51 = vld [vmem:[#allocation12 + $0x88] sm:$0xff] }
 0x131   : > { %v885_v58 = vadd.f32 %v882_v55, %v720_v54  ;;  %v1004_v54 = vld [vmem:[#allocation12 + $0x2c0] sm:$0xff]  ;;  %v929_v55 = vld [vmem:[#allocation12 + $0x68] sm:$0xff] }
 0x132   : > { %v906_v60 = vrot.slane %v902_v57, 7  ;;  %v924_v57 = vld [vmem:[#allocation12 + $0x40] sm:$0xff] }
 0x133   : > { %v893_v61 = vmul.f32 %v889_v56, %v885_v58  ;;  %v1005_v56 = vld [vmem:[#allocation12 + $0x2c8] sm:$0xff]  ;;  %v1000_v58 = vld [vmem:[#allocation12 + $0x2a0] sm:$0xff] }
 0x134   : > { %910 = vst [vmem:[#allocation3] sm:$0xfe] %v906_v60 }
 0x135   : > { %912 = vst [vmem:[#allocation3 + $0x10] sm:$0x1] %v906_v60  ;;  %v901_v62 = vadd.f32 %v897_v59, %v893_v61  ;;  %v925_v59 = vld [vmem:[#allocation12 + $0x48] sm:$0xff]  ;;  %v920_v61 = vld [vmem:[#allocation12 + $0x20] sm:$0xff] }
 0x136   : > { %v1001_v60 = vld [vmem:[#allocation12 + $0x2a8] sm:$0xff] }
 0x137   : > { %v903_v63 = vmax.f32 %v901_v62, 0.0  ;;  %v996_v62 = vld [vmem:[#allocation12 + $0x280] sm:$0xff] }
 0x139   : > { %v907_v0 = vrot.slane %v903_v63, 7  ;;  %v921_v63 = vld [vmem:[#allocation12 + $0x28] sm:$0xff] }
 0x13b   : > { %911 = vst [vmem:[#allocation3 + $0x8] sm:$0xfe] %v907_v0  ;;  %v1044_v1 = vld [vmem:[#allocation3] sm:$0xfe] }
 0x13c   : > { %913 = vst [vmem:[#allocation3 + $0x18] sm:$0x1] %v907_v0  ;;  %v1046_v2 = vld [vmem:[#allocation3 + $0x10] sm:$0x1]  ;;  %v1181_v3 = vrot.slane %v1044_v1, 1  ;;  %v916_v1 = vld [vmem:[#allocation12] sm:$0xff] }
 0x13d   : > { %v1182_v4 = vrot.slane %v1046_v2, 1  ;;  %v997_v0 = vld [vmem:[#allocation12 + $0x288] sm:$0xff]  ;;  %v992_v2 = vld [vmem:[#allocation12 + $0x260] sm:$0xff] }
 0x13f   : > { %v1183_v7 = vsel %vm553_vm1, %v1181_v3, %v1182_v4  ;;  %v917_v3 = vld [vmem:[#allocation12 + $0x8] sm:$0xff] }
 0x140   : > { %1205 = vmatmul.f32.vlgmr.msrb.gmra.mxu0 %v1183_v7  ;;  %1245 = vmatmul.f32.vlgmr.msrb.gmra.mxu2 %v1183_v7  ;;  %v993_v4 = vld [vmem:[#allocation12 + $0x268] sm:$0xff] }
 0x141   : > { %1349 = vmatpush.msrb.mxu0 %v976_v5  ;;  %1389 = vmatpush.msrb.mxu2 %v977_v6  ;;  %v978_v5 = vld [vmem:[#allocation12 + $0x1f0] sm:$0xff]  ;;  %v979_v6 = vld [vmem:[#allocation12 + $0x1f8] sm:$0xff] }
 0x142   : > { %v1045_v12 = vld [vmem:[#allocation3 + $0x8] sm:$0xfe] }
 0x143   : > { %1350 = vmatpush.msrb.mxu0 %v972_v8  ;;  %1390 = vmatpush.msrb.mxu2 %v973_v9  ;;  %v1047_v13 = vld [vmem:[#allocation3 + $0x18] sm:$0x1]  ;;  %v1184_v14 = vrot.slane %v1045_v12, 1  ;;  %v988_v8 = vld [vmem:[#allocation12 + $0x240] sm:$0xff]  ;;  %v989_v9 = vld [vmem:[#allocation12 + $0x248] sm:$0xff] }
 0x144   : > { %v1185_v15 = vrot.slane %v1047_v13, 1  ;;  %v984_v12 = vld [vmem:[#allocation12 + $0x220] sm:$0xff]  ;;  %v985_v13 = vld [vmem:[#allocation12 + $0x228] sm:$0xff] }
 0x145   : > { %1351 = vmatpush.msrb.mxu0 %v968_v10  ;;  %1391 = vmatpush.msrb.mxu2 %v969_v11  ;;  %v974_v10 = vld [vmem:[#allocation12 + $0x1d0] sm:$0xff]  ;;  %v975_v11 = vld [vmem:[#allocation12 + $0x1d8] sm:$0xff] }
 0x146   : > { %v1186_v18 = vsel %vm553_vm1, %v1184_v14, %v1185_v15  ;;  %v970_v14 = vld [vmem:[#allocation12 + $0x1b0] sm:$0xff]  ;;  %v971_v15 = vld [vmem:[#allocation12 + $0x1b8] sm:$0xff] }
 0x147   : > { %1225 = vmatmul.f32.vlgmr.msrb.gmra.mxu1 %v1186_v18  ;;  %1265 = vmatmul.f32.vlgmr.msrb.gmra.mxu3 %v1186_v18 }
 0x148   : > { %1352 = vmatpush.msrb.mxu0 %v964_v16  ;;  %1369 = vmatpush.msrb.mxu1 %v1040_v17  ;;  %v980_v16 = vld [vmem:[#allocation12 + $0x200] sm:$0xff]  ;;  %v981_v17 = vld [vmem:[#allocation12 + $0x208] sm:$0xff] }
 0x149   : > { %1392 = vmatpush.msrb.mxu2 %v965_v19  ;;  %1409 = vmatpush.msrb.mxu3 %v1041_v20  ;;  %v1042_v19 = vld [vmem:[#allocation12 + $0x3f0] sm:$0xff]  ;;  %v2653_v20 = vld [vmem:[#allocation3 + $0x8] sm:$0xff] }
 0x14a   : > { %1285 = vmatmul.f32.vlgmr.msra.gmra.mxu0 %v1183_v7  ;;  %1325 = vmatmul.f32.vlgmr.msra.gmra.mxu2 %v1183_v7  ;;  %v2649_v7 = vld [vmem:[#allocation3] sm:$0xff] }
 0x14b   : > { %1353 = vmatpush.msrb.mxu0 %v960_v21  ;;  %1370 = vmatpush.msrb.mxu1 %v1036_v22  ;;  %v967_v21 = vld [vmem:[#allocation12 + $0x198] sm:$0xff] }
 0x14c   : > { %1393 = vmatpush.msrb.mxu2 %v961_v23  ;;  %1410 = vmatpush.msrb.mxu3 %v1037_v24  ;;  %v1043_v22 = vld [vmem:[#allocation12 + $0x3f8] sm:$0xff]  ;;  %v962_v23 = vld [vmem:[#allocation12 + $0x170] sm:$0xff] }
 0x14d   : > { %1354 = vmatpush.msrb.mxu0 %v956_v25  ;;  %1371 = vmatpush.msrb.mxu1 %v1032_v26  ;;  %v1038_v24 = vld [vmem:[#allocation12 + $0x3d0] sm:$0xff]  ;;  %v963_v25 = vld [vmem:[#allocation12 + $0x178] sm:$0xff] }
 0x14e   : > { %1394 = vmatpush.msrb.mxu2 %v957_v27  ;;  %1411 = vmatpush.msrb.mxu3 %v1033_v28  ;;  %v1039_v26 = vld [vmem:[#allocation12 + $0x3d8] sm:$0xff]  ;;  %v958_v27 = vld [vmem:[#allocation12 + $0x150] sm:$0xff] }
 0x14f   : > { %1355 = vmatpush.msrb.mxu0 %v952_v29  ;;  %1372 = vmatpush.msrb.mxu1 %v1028_v30  ;;  %v1034_v28 = vld [vmem:[#allocation12 + $0x3b0] sm:$0xff]  ;;  %v959_v29 = vld [vmem:[#allocation12 + $0x158] sm:$0xff] }
 0x150   : > { %1395 = vmatpush.msrb.mxu2 %v953_v31  ;;  %1412 = vmatpush.msrb.mxu3 %v1029_v32  ;;  %v1035_v30 = vld [vmem:[#allocation12 + $0x3b8] sm:$0xff]  ;;  %v954_v31 = vld [vmem:[#allocation12 + $0x130] sm:$0xff] }
 0x151   : > { %1305 = vmatmul.f32.vlgmr.msra.gmra.mxu1 %v1186_v18  ;;  %1345 = vmatmul.f32.vlgmr.msra.gmra.mxu3 %v1186_v18  ;;  %v966_v18 = vld [vmem:[#allocation12 + $0x190] sm:$0xff] }
 0x152   : > { %1356 = vmatpush.msrb.mxu0 %v948_v33  ;;  %1373 = vmatpush.msrb.mxu1 %v1024_v34  ;;  %v1030_v32 = vld [vmem:[#allocation12 + $0x390] sm:$0xff]  ;;  %v955_v33 = vld [vmem:[#allocation12 + $0x138] sm:$0xff] }
 0x153   : > { %1396 = vmatpush.msrb.mxu2 %v949_v35  ;;  %1413 = vmatpush.msrb.mxu3 %v1025_v36  ;;  %v1031_v34 = vld [vmem:[#allocation12 + $0x398] sm:$0xff]  ;;  %v950_v35 = vld [vmem:[#allocation12 + $0x110] sm:$0xff] }
 0x154   : > { %1357 = vmatpush.msrb.mxu0 %v944_v37  ;;  %1374 = vmatpush.msrb.mxu1 %v1020_v38  ;;  %v1026_v36 = vld [vmem:[#allocation12 + $0x370] sm:$0xff]  ;;  %v951_v37 = vld [vmem:[#allocation12 + $0x118] sm:$0xff] }
 0x155   : > { %1397 = vmatpush.msrb.mxu2 %v945_v39  ;;  %1414 = vmatpush.msrb.mxu3 %v1021_v40  ;;  %v1027_v38 = vld [vmem:[#allocation12 + $0x378] sm:$0xff]  ;;  %v946_v39 = vld [vmem:[#allocation12 + $0xf0] sm:$0xff] }
 0x156   : > { %1358 = vmatpush.msrb.mxu0 %v940_v41  ;;  %1375 = vmatpush.msrb.mxu1 %v1016_v42  ;;  %v1022_v40 = vld [vmem:[#allocation12 + $0x350] sm:$0xff]  ;;  %v947_v41 = vld [vmem:[#allocation12 + $0xf8] sm:$0xff] }
 0x157   : > { %1398 = vmatpush.msrb.mxu2 %v941_v43  ;;  %1415 = vmatpush.msrb.mxu3 %v1017_v44  ;;  %v1023_v42 = vld [vmem:[#allocation12 + $0x358] sm:$0xff]  ;;  %v942_v43 = vld [vmem:[#allocation12 + $0xd0] sm:$0xff] }
 0x158   : > { %1359 = vmatpush.msrb.mxu0 %v936_v45  ;;  %1376 = vmatpush.msrb.mxu1 %v1012_v46  ;;  %v1018_v44 = vld [vmem:[#allocation12 + $0x330] sm:$0xff]  ;;  %v943_v45 = vld [vmem:[#allocation12 + $0xd8] sm:$0xff] }
 0x159   : > { %1399 = vmatpush.msrb.mxu2 %v937_v47  ;;  %1416 = vmatpush.msrb.mxu3 %v1013_v48  ;;  %v1019_v46 = vld [vmem:[#allocation12 + $0x338] sm:$0xff]  ;;  %v938_v47 = vld [vmem:[#allocation12 + $0xb0] sm:$0xff] }
 0x15a   : > { %1360 = vmatpush.msrb.mxu0 %v932_v49  ;;  %1377 = vmatpush.msrb.mxu1 %v1008_v50  ;;  %v1014_v48 = vld [vmem:[#allocation12 + $0x310] sm:$0xff]  ;;  %v939_v49 = vld [vmem:[#allocation12 + $0xb8] sm:$0xff] }
 0x15b   : > { %1400 = vmatpush.msrb.mxu2 %v933_v51  ;;  %1417 = vmatpush.msrb.mxu3 %v1009_v52  ;;  %v1015_v50 = vld [vmem:[#allocation12 + $0x318] sm:$0xff]  ;;  %v934_v51 = vld [vmem:[#allocation12 + $0x90] sm:$0xff] }
 0x15c   : > { %1361 = vmatpush.msrb.mxu0 %v928_v53  ;;  %1378 = vmatpush.msrb.mxu1 %v1004_v54  ;;  %v1010_v52 = vld [vmem:[#allocation12 + $0x2f0] sm:$0xff]  ;;  %v935_v53 = vld [vmem:[#allocation12 + $0x98] sm:$0xff] }
 0x15d   : > { %1401 = vmatpush.msrb.mxu2 %v929_v55  ;;  %1418 = vmatpush.msrb.mxu3 %v1005_v56  ;;  %v1011_v54 = vld [vmem:[#allocation12 + $0x2f8] sm:$0xff]  ;;  %v930_v55 = vld [vmem:[#allocation12 + $0x70] sm:$0xff] }
 0x15e   : > { %1362 = vmatpush.msrb.mxu0 %v924_v57  ;;  %1379 = vmatpush.msrb.mxu1 %v1000_v58  ;;  %v1006_v56 = vld [vmem:[#allocation12 + $0x2d0] sm:$0xff]  ;;  %v931_v57 = vld [vmem:[#allocation12 + $0x78] sm:$0xff] }
 0x15f   : > { %1402 = vmatpush.msrb.mxu2 %v925_v59  ;;  %1419 = vmatpush.msrb.mxu3 %v1001_v60  ;;  %v1007_v58 = vld [vmem:[#allocation12 + $0x2d8] sm:$0xff]  ;;  %v926_v59 = vld [vmem:[#allocation12 + $0x50] sm:$0xff] }
 0x160   : > { %1363 = vmatpush.msrb.mxu0 %v920_v61  ;;  %1380 = vmatpush.msrb.mxu1 %v996_v62  ;;  %v1002_v60 = vld [vmem:[#allocation12 + $0x2b0] sm:$0xff]  ;;  %v927_v61 = vld [vmem:[#allocation12 + $0x58] sm:$0xff] }
 0x161   : > { %1403 = vmatpush.msrb.mxu2 %v921_v63  ;;  %1420 = vmatpush.msrb.mxu3 %v997_v0  ;;  %v1003_v62 = vld [vmem:[#allocation12 + $0x2b8] sm:$0xff]  ;;  %v922_v63 = vld [vmem:[#allocation12 + $0x30] sm:$0xff] }
 0x162   : > { %1364 = vmatpush.msrb.mxu0 %v916_v1  ;;  %1381 = vmatpush.msrb.mxu1 %v992_v2  ;;  %v998_v0 = vld [vmem:[#allocation12 + $0x290] sm:$0xff]  ;;  %v923_v1 = vld [vmem:[#allocation12 + $0x38] sm:$0xff] }
 0x163   : > { %1404 = vmatpush.msrb.mxu2 %v917_v3  ;;  %1421 = vmatpush.msrb.mxu3 %v993_v4  ;;  %v999_v2 = vld [vmem:[#allocation12 + $0x298] sm:$0xff]  ;;  %v918_v3 = vld [vmem:[#allocation12 + $0x10] sm:$0xff] }
 0x164   : > { %1365 = vmatmul.f32.vlgmr.msrb.gmra.mxu0 %v2649_v7  ;;  %1405 = vmatmul.f32.vlgmr.msrb.gmra.mxu2 %v2649_v7  ;;  %v994_v4 = vld [vmem:[#allocation12 + $0x270] sm:$0xff] }
 0x165   : > { %1429 = vmatpush.msra.mxu0 %v978_v5  ;;  %1469 = vmatpush.msra.mxu2 %v979_v6  ;;  %v919_v5 = vld [vmem:[#allocation12 + $0x18] sm:$0xff] }
 0x166   : > { %1382 = vmatpush.msrb.mxu1 %v988_v8  ;;  %1422 = vmatpush.msrb.mxu3 %v989_v9  ;;  %v995_v6 = vld [vmem:[#allocation12 + $0x278] sm:$0xff]  ;;  %v1574_v8 = vld [vmem:[#allocation12 + $0x9e0] sm:$0xff]  ;;  %v1575_v9 = vld [vmem:[#allocation12 + $0x9e8] sm:$0xff] }
 0x167   : > { %1430 = vmatpush.msra.mxu0 %v974_v10  ;;  %1470 = vmatpush.msra.mxu2 %v975_v11  ;;  %v990_v10 = vld [vmem:[#allocation12 + $0x250] sm:$0xff]  ;;  %v991_v11 = vld [vmem:[#allocation12 + $0x258] sm:$0xff] }
 0x168   : > { %1383 = vmatpush.msrb.mxu1 %v984_v12  ;;  %1423 = vmatpush.msrb.mxu3 %v985_v13  ;;  %v1570_v12 = vld [vmem:[#allocation12 + $0x9c0] sm:$0xff]  ;;  %v1571_v13 = vld [vmem:[#allocation12 + $0x9c8] sm:$0xff] }
 0x169   : > { %1431 = vmatpush.msra.mxu0 %v970_v14  ;;  %1471 = vmatpush.msra.mxu2 %v971_v15  ;;  %v986_v14 = vld [vmem:[#allocation12 + $0x230] sm:$0xff]  ;;  %v987_v15 = vld [vmem:[#allocation12 + $0x238] sm:$0xff] }
 0x16a   : > { %1384 = vmatpush.msrb.mxu1 %v980_v16  ;;  %1424 = vmatpush.msrb.mxu3 %v981_v17  ;;  %v1566_v16 = vld [vmem:[#allocation12 + $0x9a0] sm:$0xff]  ;;  %v1567_v17 = vld [vmem:[#allocation12 + $0x9a8] sm:$0xff] }
 0x16b   : > { %1385 = vmatmul.f32.vlgmr.msrb.gmra.mxu1 %v2653_v20  ;;  %1425 = vmatmul.f32.vlgmr.msrb.gmra.mxu3 %v2653_v20 }
 0x16c   : > { %1432 = vmatpush.msra.mxu0 %v966_v18  ;;  %1449 = vmatpush.msra.mxu1 %v1042_v19  ;;  %v982_v18 = vld [vmem:[#allocation12 + $0x210] sm:$0xff]  ;;  %v983_v19 = vld [vmem:[#allocation12 + $0x218] sm:$0xff] }
 0x16d   : > { %1472 = vmatpush.msra.mxu2 %v967_v21  ;;  %1489 = vmatpush.msra.mxu3 %v1043_v22  ;;  %v1562_v21 = vld [vmem:[#allocation12 + $0x980] sm:$0xff]  ;;  %v1563_v22 = vld [vmem:[#allocation12 + $0x988] sm:$0xff] }
 0x16e   : > { %1433 = vmatpush.msra.mxu0 %v962_v23  ;;  %1450 = vmatpush.msra.mxu1 %v1038_v24  ;;  %v1639_v23 = vld [vmem:[#allocation12 + $0xbe8] sm:$0xff]  ;;  %v1558_v24 = vld [vmem:[#allocation12 + $0x960] sm:$0xff] }
 0x16f   : > { %1473 = vmatpush.msra.mxu2 %v963_v25  ;;  %1490 = vmatpush.msra.mxu3 %v1039_v26  ;;  %v1634_v25 = vld [vmem:[#allocation12 + $0xbc0] sm:$0xff]  ;;  %v1559_v26 = vld [vmem:[#allocation12 + $0x968] sm:$0xff] }
 0x170   : > { %1434 = vmatpush.msra.mxu0 %v958_v27  ;;  %1451 = vmatpush.msra.mxu1 %v1034_v28  ;;  %v1635_v27 = vld [vmem:[#allocation12 + $0xbc8] sm:$0xff]  ;;  %v1554_v28 = vld [vmem:[#allocation12 + $0x940] sm:$0xff] }
 0x171   : > { %1474 = vmatpush.msra.mxu2 %v959_v29  ;;  %1491 = vmatpush.msra.mxu3 %v1035_v30  ;;  %v1630_v29 = vld [vmem:[#allocation12 + $0xba0] sm:$0xff]  ;;  %v1555_v30 = vld [vmem:[#allocation12 + $0x948] sm:$0xff] }
 0x172   : > { %1435 = vmatpush.msra.mxu0 %v954_v31  ;;  %1452 = vmatpush.msra.mxu1 %v1030_v32  ;;  %v1631_v31 = vld [vmem:[#allocation12 + $0xba8] sm:$0xff]  ;;  %v1550_v32 = vld [vmem:[#allocation12 + $0x920] sm:$0xff] }
 0x173   : > { %1475 = vmatpush.msra.mxu2 %v955_v33  ;;  %1492 = vmatpush.msra.mxu3 %v1031_v34  ;;  %v1626_v33 = vld [vmem:[#allocation12 + $0xb80] sm:$0xff]  ;;  %v1627_v34 = vld [vmem:[#allocation12 + $0xb88] sm:$0xff] }
 0x174   : > { %1436 = vmatpush.msra.mxu0 %v950_v35  ;;  %1453 = vmatpush.msra.mxu1 %v1026_v36  ;;  %v1546_v35 = vld [vmem:[#allocation12 + $0x900] sm:$0xff] }
 0x175   : > { %1476 = vmatpush.msra.mxu2 %v951_v37  ;;  %1493 = vmatpush.msra.mxu3 %v1027_v38  ;;  %v1622_v36 = vld [vmem:[#allocation12 + $0xb60] sm:$0xff]  ;;  %v1547_v37 = vld [vmem:[#allocation12 + $0x908] sm:$0xff] }
 0x176   : > { %1437 = vmatpush.msra.mxu0 %v946_v39  ;;  %1454 = vmatpush.msra.mxu1 %v1022_v40  ;;  %v1623_v38 = vld [vmem:[#allocation12 + $0xb68] sm:$0xff]  ;;  %v1542_v39 = vld [vmem:[#allocation12 + $0x8e0] sm:$0xff] }
 0x177   : > { %1477 = vmatpush.msra.mxu2 %v947_v41  ;;  %1494 = vmatpush.msra.mxu3 %v1023_v42  ;;  %v1618_v40 = vld [vmem:[#allocation12 + $0xb40] sm:$0xff]  ;;  %v1543_v41 = vld [vmem:[#allocation12 + $0x8e8] sm:$0xff] }
 0x178   : > { %1438 = vmatpush.msra.mxu0 %v942_v43  ;;  %1455 = vmatpush.msra.mxu1 %v1018_v44  ;;  %v1619_v42 = vld [vmem:[#allocation12 + $0xb48] sm:$0xff]  ;;  %v1538_v43 = vld [vmem:[#allocation12 + $0x8c0] sm:$0xff] }
 0x179   : > { %1478 = vmatpush.msra.mxu2 %v943_v45  ;;  %1495 = vmatpush.msra.mxu3 %v1019_v46  ;;  %v1614_v44 = vld [vmem:[#allocation12 + $0xb20] sm:$0xff]  ;;  %v1539_v45 = vld [vmem:[#allocation12 + $0x8c8] sm:$0xff] }
 0x17a   : > { %1439 = vmatpush.msra.mxu0 %v938_v47  ;;  %1456 = vmatpush.msra.mxu1 %v1014_v48  ;;  %v1615_v46 = vld [vmem:[#allocation12 + $0xb28] sm:$0xff]  ;;  %v1534_v47 = vld [vmem:[#allocation12 + $0x8a0] sm:$0xff] }
 0x17b   : > { %1479 = vmatpush.msra.mxu2 %v939_v49  ;;  %1496 = vmatpush.msra.mxu3 %v1015_v50  ;;  %v1610_v48 = vld [vmem:[#allocation12 + $0xb00] sm:$0xff]  ;;  %v1535_v49 = vld [vmem:[#allocation12 + $0x8a8] sm:$0xff] }
 0x17c   : > { %1440 = vmatpush.msra.mxu0 %v934_v51  ;;  %1457 = vmatpush.msra.mxu1 %v1010_v52  ;;  %v1611_v50 = vld [vmem:[#allocation12 + $0xb08] sm:$0xff]  ;;  %v1530_v51 = vld [vmem:[#allocation12 + $0x880] sm:$0xff] }
 0x17d   : > { %1480 = vmatpush.msra.mxu2 %v935_v53  ;;  %1497 = vmatpush.msra.mxu3 %v1011_v54  ;;  %v1606_v52 = vld [vmem:[#allocation12 + $0xae0] sm:$0xff]  ;;  %v1531_v53 = vld [vmem:[#allocation12 + $0x888] sm:$0xff] }
 0x17e   : > { %1441 = vmatpush.msra.mxu0 %v930_v55  ;;  %1458 = vmatpush.msra.mxu1 %v1006_v56  ;;  %v1607_v54 = vld [vmem:[#allocation12 + $0xae8] sm:$0xff]  ;;  %v1526_v55 = vld [vmem:[#allocation12 + $0x860] sm:$0xff] }
 0x17f   : > { %1481 = vmatpush.msra.mxu2 %v931_v57  ;;  %1498 = vmatpush.msra.mxu3 %v1007_v58  ;;  %v1602_v56 = vld [vmem:[#allocation12 + $0xac0] sm:$0xff]  ;;  %v1527_v57 = vld [vmem:[#allocation12 + $0x868] sm:$0xff] }
 0x180   : > { %1442 = vmatpush.msra.mxu0 %v926_v59  ;;  %1459 = vmatpush.msra.mxu1 %v1002_v60  ;;  %v1603_v58 = vld [vmem:[#allocation12 + $0xac8] sm:$0xff]  ;;  %v1522_v59 = vld [vmem:[#allocation12 + $0x840] sm:$0xff] }
 0x181   : > { %1482 = vmatpush.msra.mxu2 %v927_v61  ;;  %1499 = vmatpush.msra.mxu3 %v1003_v62  ;;  %v1598_v60 = vld [vmem:[#allocation12 + $0xaa0] sm:$0xff]  ;;  %v1523_v62 = vld [vmem:[#allocation12 + $0x848] sm:$0xff] }
 0x182   : > { %1443 = vmatpush.msra.mxu0 %v922_v63  ;;  %1460 = vmatpush.msra.mxu1 %v998_v0  ;;  %v1509_v61 = vld [vmem:[#allocation3] sm:$0xfc]  ;;  %v1599_v63 = vld [vmem:[#allocation12 + $0xaa8] sm:$0xff] }
 0x183   : > { %1483 = vmatpush.msra.mxu2 %v923_v1  ;;  %1500 = vmatpush.msra.mxu3 %v999_v2  ;;  %v1511_v0 = vld [vmem:[#allocation3 + $0x10] sm:$0x3]  ;;  %v1518_v1 = vld [vmem:[#allocation12 + $0x820] sm:$0xff] }
 0x184   : > { %1444 = vmatpush.msra.mxu0 %v918_v3  ;;  %1461 = vmatpush.msra.mxu1 %v994_v4  ;;  %v1594_v2 = vld [vmem:[#allocation12 + $0xa80] sm:$0xff]  ;;  %v1519_v3 = vld [vmem:[#allocation12 + $0x828] sm:$0xff] }
 0x185   : > { %1484 = vmatpush.msra.mxu2 %v919_v5  ;;  %1501 = vmatpush.msra.mxu3 %v995_v6  ;;  %v1595_v4 = vld [vmem:[#allocation12 + $0xa88] sm:$0xff]  ;;  %v1514_v5 = vld [vmem:[#allocation12 + $0x800] sm:$0xff] }
 0x186   : > { %1445 = vmatmul.f32.vlgmr.msra.gmra.mxu0 %v2649_v7  ;;  %1485 = vmatmul.f32.vlgmr.msra.gmra.mxu2 %v2649_v7  ;;  %v1638_v7 = vld [vmem:[#allocation12 + $0xbe0] sm:$0xff] }
 0x187   : > { %1654 = vmatpush.msrb.mxu0 %v1574_v8  ;;  %1694 = vmatpush.msrb.mxu2 %v1575_v9  ;;  %v1590_v6 = vld [vmem:[#allocation12 + $0xa60] sm:$0xff]  ;;  %v1646_v8 = vrot.slane %v1509_v61, 2  ;;  %v1647_v9 = vrot.slane %v1511_v0, 2  ;;  %v1532_v61 = vld [vmem:[#allocation12 + $0x890] sm:$0xff]  ;;  %v1609_v0 = vld [vmem:[#allocation12 + $0xaf8] sm:$0xff] }
 0x188   : > { %1462 = vmatpush.msra.mxu1 %v990_v10  ;;  %1502 = vmatpush.msra.mxu3 %v991_v11  ;;  %v1515_v10 = vld [vmem:[#allocation12 + $0x808] sm:$0xff] }
 0x189   : > { %1655 = vmatpush.msrb.mxu0 %v1570_v12  ;;  %1695 = vmatpush.msrb.mxu2 %v1571_v13  ;;  %v1591_v11 = vld [vmem:[#allocation12 + $0xa68] sm:$0xff]  ;;  %v1576_v12 = vld [vmem:[#allocation12 + $0x9f0] sm:$0xff]  ;;  %v1577_v13 = vld [vmem:[#allocation12 + $0x9f8] sm:$0xff] }
 0x18a   : > { %1463 = vmatpush.msra.mxu1 %v986_v14  ;;  %1503 = vmatpush.msra.mxu3 %v987_v15  ;;  %v1510_v14 = vld [vmem:[#allocation3 + $0x8] sm:$0xfc]  ;;  %v2662_v15 = vsel %vm795_vm2, %v1646_v8, %v1647_v9  ;;  %v1525_v8 = vld [vmem:[#allocation12 + $0x858] sm:$0xff] }
 0x18b   : > { %1656 = vmatpush.msrb.mxu0 %v1566_v16  ;;  %1696 = vmatpush.msrb.mxu2 %v1567_v17  ;;  %v1586_v16 = vld [vmem:[#allocation12 + $0xa40] sm:$0xff]  ;;  %v1587_v17 = vld [vmem:[#allocation12 + $0xa48] sm:$0xff]  ;;  %v1601_v9 = vld [vmem:[#allocation12 + $0xab8] sm:$0xff] }
 0x18c   : > { %1464 = vmatpush.msra.mxu1 %v982_v18  ;;  %1504 = vmatpush.msra.mxu3 %v983_v19  ;;  %v1512_v18 = vld [vmem:[#allocation3 + $0x18] sm:$0x3] }
 0x18d   : > { %1465 = vmatmul.f32.vlgmr.msra.gmra.mxu1 %v2653_v20  ;;  %1505 = vmatmul.f32.vlgmr.msra.gmra.mxu3 %v2653_v20  ;;  %v1551_v20 = vld [vmem:[#allocation12 + $0x928] sm:$0xff]  ;;  %v1572_v19 = vld [vmem:[#allocation12 + $0x9d0] sm:$0xff] }
 0x18e   : > { %1657 = vmatpush.msrb.mxu0 %v1562_v21  ;;  %1674 = vmatpush.msrb.mxu1 %v1638_v7  ;;  %v1573_v21 = vld [vmem:[#allocation12 + $0x9d8] sm:$0xff]  ;;  %v1582_v7 = vld [vmem:[#allocation12 + $0xa20] sm:$0xff] }
 0x18f   : > { %1697 = vmatpush.msrb.mxu2 %v1563_v22  ;;  %1714 = vmatpush.msrb.mxu3 %v1639_v23  ;;  %v1583_v22 = vld [vmem:[#allocation12 + $0xa28] sm:$0xff]  ;;  %v1568_v23 = vld [vmem:[#allocation12 + $0x9b0] sm:$0xff] }
 0x190   : > { %1658 = vmatpush.msrb.mxu0 %v1558_v24  ;;  %1675 = vmatpush.msrb.mxu1 %v1634_v25  ;;  %v1569_v24 = vld [vmem:[#allocation12 + $0x9b8] sm:$0xff]  ;;  %v1649_v25 = vrot.slane %v1510_v14, 2  ;;  %v1516_v14 = vld [vmem:[#allocation12 + $0x810] sm:$0xff] }
 0x191   : > { %1698 = vmatpush.msrb.mxu2 %v1559_v26  ;;  %1715 = vmatpush.msrb.mxu3 %v1635_v27  ;;  %v1650_v26 = vrot.slane %v1512_v18, 2  ;;  %v1578_v27 = vld [vmem:[#allocation12 + $0xa00] sm:$0xff]  ;;  %v1593_v18 = vld [vmem:[#allocation12 + $0xa78] sm:$0xff] }
 0x192   : > { %1659 = vmatpush.msrb.mxu0 %v1554_v28  ;;  %1676 = vmatpush.msrb.mxu1 %v1630_v29  ;;  %v1579_v28 = vld [vmem:[#allocation12 + $0xa08] sm:$0xff]  ;;  %v1564_v29 = vld [vmem:[#allocation12 + $0x990] sm:$0xff] }
 0x193   : > { %1699 = vmatpush.msrb.mxu2 %v1555_v30  ;;  %1716 = vmatpush.msrb.mxu3 %v1631_v31  ;;  %v1640_v30 = vld [vmem:[#allocation12 + $0xbf0] sm:$0xff]  ;;  %v2667_v31 = vsel %vm795_vm2, %v1649_v25, %v1650_v26 }
 0x194   : > { %1660 = vmatpush.msrb.mxu0 %v1550_v32  ;;  %1677 = vmatpush.msrb.mxu1 %v1626_v33  ;;  %v1565_v32 = vld [vmem:[#allocation12 + $0x998] sm:$0xff] }
 0x195   : > { %1700 = vmatpush.msrb.mxu2 %v1551_v20  ;;  %1717 = vmatpush.msrb.mxu3 %v1627_v34  ;;  %v1641_v33 = vld [vmem:[#allocation12 + $0xbf8] sm:$0xff]  ;;  %v1560_v20 = vld [vmem:[#allocation12 + $0x970] sm:$0xff] }
 0x196   : > { %1661 = vmatpush.msrb.mxu0 %v1546_v35  ;;  %1678 = vmatpush.msrb.mxu1 %v1622_v36  ;;  %v1636_v34 = vld [vmem:[#allocation12 + $0xbd0] sm:$0xff]  ;;  %v1561_v35 = vld [vmem:[#allocation12 + $0x978] sm:$0xff] }
 0x197   : > { %1701 = vmatpush.msrb.mxu2 %v1547_v37  ;;  %1718 = vmatpush.msrb.mxu3 %v1623_v38  ;;  %v1637_v36 = vld [vmem:[#allocation12 + $0xbd8] sm:$0xff]  ;;  %v1556_v37 = vld [vmem:[#allocation12 + $0x950] sm:$0xff] }
 0x198   : > { %1662 = vmatpush.msrb.mxu0 %v1542_v39  ;;  %1679 = vmatpush.msrb.mxu1 %v1618_v40  ;;  %v1632_v38 = vld [vmem:[#allocation12 + $0xbb0] sm:$0xff]  ;;  %v1557_v39 = vld [vmem:[#allocation12 + $0x958] sm:$0xff] }
 0x199   : > { %1702 = vmatpush.msrb.mxu2 %v1543_v41  ;;  %1719 = vmatpush.msrb.mxu3 %v1619_v42  ;;  %v1633_v40 = vld [vmem:[#allocation12 + $0xbb8] sm:$0xff]  ;;  %v1552_v41 = vld [vmem:[#allocation12 + $0x930] sm:$0xff] }
 0x19a   : > { %1663 = vmatpush.msrb.mxu0 %v1538_v43  ;;  %1680 = vmatpush.msrb.mxu1 %v1614_v44  ;;  %v1628_v42 = vld [vmem:[#allocation12 + $0xb90] sm:$0xff]  ;;  %v1553_v43 = vld [vmem:[#allocation12 + $0x938] sm:$0xff] }
 0x19b   : > { %1703 = vmatpush.msrb.mxu2 %v1539_v45  ;;  %1720 = vmatpush.msrb.mxu3 %v1615_v46  ;;  %v1629_v44 = vld [vmem:[#allocation12 + $0xb98] sm:$0xff]  ;;  %v1548_v45 = vld [vmem:[#allocation12 + $0x910] sm:$0xff] }
 0x19c   : > { %1664 = vmatpush.msrb.mxu0 %v1534_v47  ;;  %1681 = vmatpush.msrb.mxu1 %v1610_v48  ;;  %v1624_v46 = vld [vmem:[#allocation12 + $0xb70] sm:$0xff]  ;;  %v1549_v47 = vld [vmem:[#allocation12 + $0x918] sm:$0xff] }
 0x19d   : > { %1704 = vmatpush.msrb.mxu2 %v1535_v49  ;;  %1721 = vmatpush.msrb.mxu3 %v1611_v50  ;;  %v1625_v48 = vld [vmem:[#allocation12 + $0xb78] sm:$0xff]  ;;  %v1544_v49 = vld [vmem:[#allocation12 + $0x8f0] sm:$0xff] }
 0x19e   : > { %1665 = vmatpush.msrb.mxu0 %v1530_v51  ;;  %1682 = vmatpush.msrb.mxu1 %v1606_v52  ;;  %v1620_v50 = vld [vmem:[#allocation12 + $0xb50] sm:$0xff]  ;;  %v1545_v51 = vld [vmem:[#allocation12 + $0x8f8] sm:$0xff] }
 0x19f   : > { %1705 = vmatpush.msrb.mxu2 %v1531_v53  ;;  %1722 = vmatpush.msrb.mxu3 %v1607_v54  ;;  %v1621_v52 = vld [vmem:[#allocation12 + $0xb58] sm:$0xff]  ;;  %v1540_v53 = vld [vmem:[#allocation12 + $0x8d0] sm:$0xff] }
 0x1a0   : > { %1666 = vmatpush.msrb.mxu0 %v1526_v55  ;;  %1683 = vmatpush.msrb.mxu1 %v1602_v56  ;;  %v1616_v54 = vld [vmem:[#allocation12 + $0xb30] sm:$0xff]  ;;  %v1541_v55 = vld [vmem:[#allocation12 + $0x8d8] sm:$0xff] }
 0x1a1   : > { %1706 = vmatpush.msrb.mxu2 %v1527_v57  ;;  %1723 = vmatpush.msrb.mxu3 %v1603_v58  ;;  %v1617_v56 = vld [vmem:[#allocation12 + $0xb38] sm:$0xff]  ;;  %v1536_v57 = vld [vmem:[#allocation12 + $0x8b0] sm:$0xff] }
 0x1a2   : > { %1667 = vmatpush.msrb.mxu0 %v1522_v59  ;;  %1684 = vmatpush.msrb.mxu1 %v1598_v60  ;;  %v1612_v58 = vld [vmem:[#allocation12 + $0xb10] sm:$0xff]  ;;  %v1537_v59 = vld [vmem:[#allocation12 + $0x8b8] sm:$0xff] }
 0x1a3   : > { %1707 = vmatpush.msrb.mxu2 %v1523_v62  ;;  %1724 = vmatpush.msrb.mxu3 %v1599_v63  ;;  %v1613_v60 = vld [vmem:[#allocation12 + $0xb18] sm:$0xff]  ;;  %v1608_v62 = vld [vmem:[#allocation12 + $0xaf0] sm:$0xff] }
 0x1a4   : > { %1668 = vmatpush.msrb.mxu0 %v1518_v1  ;;  %1685 = vmatpush.msrb.mxu1 %v1594_v2  ;;  %v1533_v63 = vld [vmem:[#allocation12 + $0x898] sm:$0xff]  ;;  %v1528_v1 = vld [vmem:[#allocation12 + $0x870] sm:$0xff] }
 0x1a5   : > { %1708 = vmatpush.msrb.mxu2 %v1519_v3  ;;  %1725 = vmatpush.msrb.mxu3 %v1595_v4  ;;  %v1604_v2 = vld [vmem:[#allocation12 + $0xad0] sm:$0xff]  ;;  %v1529_v3 = vld [vmem:[#allocation12 + $0x878] sm:$0xff] }
 0x1a6   : > { %1669 = vmatpush.msrb.mxu0 %v1514_v5  ;;  %1686 = vmatpush.msrb.mxu1 %v1590_v6  ;;  %v1605_v4 = vld [vmem:[#allocation12 + $0xad8] sm:$0xff]  ;;  %v1524_v5 = vld [vmem:[#allocation12 + $0x850] sm:$0xff] }
 0x1a7   : > { %1709 = vmatpush.msrb.mxu2 %v1515_v10  ;;  %1726 = vmatpush.msrb.mxu3 %v1591_v11  ;;  %v1600_v6 = vld [vmem:[#allocation12 + $0xab0] sm:$0xff] }
 0x1a8   : > { %1670 = vmatmul.f32.vlgmr.msrb.gmra.mxu0 %v2662_v15  ;;  %1710 = vmatmul.f32.vlgmr.msrb.gmra.mxu2 %v2662_v15  ;;  %v1520_v10 = vld [vmem:[#allocation12 + $0x830] sm:$0xff] }
 0x1a9   : > { %1734 = vmatpush.msra.mxu0 %v1576_v12  ;;  %1774 = vmatpush.msra.mxu2 %v1577_v13  ;;  %v1596_v11 = vld [vmem:[#allocation12 + $0xa90] sm:$0xff]  ;;  %v1521_v12 = vld [vmem:[#allocation12 + $0x838] sm:$0xff] }
 0x1aa   : > { %1687 = vmatpush.msrb.mxu1 %v1586_v16  ;;  %1727 = vmatpush.msrb.mxu3 %v1587_v17  ;;  %v1597_v13 = vld [vmem:[#allocation12 + $0xa98] sm:$0xff]  ;;  %v1592_v16 = vld [vmem:[#allocation12 + $0xa70] sm:$0xff] }
 0x1ab   : > { %1735 = vmatpush.msra.mxu0 %v1572_v19  ;;  %1775 = vmatpush.msra.mxu2 %v1573_v21  ;;  %v1517_v17 = vld [vmem:[#allocation12 + $0x818] sm:$0xff]  ;;  %v1588_v19 = vld [vmem:[#allocation12 + $0xa50] sm:$0xff] }
 0x1ac   : > { %1688 = vmatpush.msrb.mxu1 %v1582_v7  ;;  %1728 = vmatpush.msrb.mxu3 %v1583_v22  ;;  %v1589_v21 = vld [vmem:[#allocation12 + $0xa58] sm:$0xff]  ;;  %v1584_v7 = vld [vmem:[#allocation12 + $0xa30] sm:$0xff] }
 0x1ad   : > { %1736 = vmatpush.msra.mxu0 %v1568_v23  ;;  %1776 = vmatpush.msra.mxu2 %v1569_v24  ;;  %v1585_v22 = vld [vmem:[#allocation12 + $0xa38] sm:$0xff]  ;;  %v1580_v23 = vld [vmem:[#allocation12 + $0xa10] sm:$0xff] }
 0x1ae   : > { %1689 = vmatpush.msrb.mxu1 %v1578_v27  ;;  %1729 = vmatpush.msrb.mxu3 %v1579_v28  ;;  %v1581_v24 = vld [vmem:[#allocation12 + $0xa18] sm:$0xff] }
 0x1af   : > { %1690 = vmatmul.f32.vlgmr.msrb.gmra.mxu1 %v2667_v31  ;;  %1730 = vmatmul.f32.vlgmr.msrb.gmra.mxu3 %v2667_v31 }
 0x1b0   : > { %1737 = vmatpush.msra.mxu0 %v1564_v29  ;;  %1754 = vmatpush.msra.mxu1 %v1640_v30 }
 0x1b1   : > { %1777 = vmatpush.msra.mxu2 %v1565_v32  ;;  %1794 = vmatpush.msra.mxu3 %v1641_v33 }
 0x1b2   : > { %1738 = vmatpush.msra.mxu0 %v1560_v20  ;;  %1755 = vmatpush.msra.mxu1 %v1636_v34 }
 0x1b3   : > { %1778 = vmatpush.msra.mxu2 %v1561_v35  ;;  %1795 = vmatpush.msra.mxu3 %v1637_v36 }
 0x1b4   : > { %1739 = vmatpush.msra.mxu0 %v1556_v37  ;;  %1756 = vmatpush.msra.mxu1 %v1632_v38 }
 0x1b5   : > { %1779 = vmatpush.msra.mxu2 %v1557_v39  ;;  %1796 = vmatpush.msra.mxu3 %v1633_v40 }
 0x1b6   : > { %1740 = vmatpush.msra.mxu0 %v1552_v41  ;;  %1757 = vmatpush.msra.mxu1 %v1628_v42  ;;  %v1818_v41 = vld [vmem:[#allocation13] sm:$0xf] }
 0x1b7   : > { %1780 = vmatpush.msra.mxu2 %v1553_v43  ;;  %1797 = vmatpush.msra.mxu3 %v1629_v44  ;;  %v1832_v44 = vld [vmem:[#allocation15] sm:$0xf] }
 0x1b8   : > { %1741 = vmatpush.msra.mxu0 %v1548_v45  ;;  %1758 = vmatpush.msra.mxu1 %v1624_v46 }
 0x1b9   : > { %1781 = vmatpush.msra.mxu2 %v1549_v47  ;;  %1798 = vmatpush.msra.mxu3 %v1625_v48  ;;  %v1820_v47 = vperm.slane %v1818_v41, 0 }
 0x1ba   : > { %1742 = vmatpush.msra.mxu0 %v1544_v49  ;;  %1759 = vmatpush.msra.mxu1 %v1620_v50  ;;  %v1834_v50 = vperm.slane %v1832_v44, 0 }
 0x1bb   : > { %1782 = vmatpush.msra.mxu2 %v1545_v51  ;;  %1799 = vmatpush.msra.mxu3 %v1621_v52 }
 0x1bc   : > { %1743 = vmatpush.msra.mxu0 %v1540_v53  ;;  %1760 = vmatpush.msra.mxu1 %v1616_v54 }
 0x1bd   : > { %1783 = vmatpush.msra.mxu2 %v1541_v55  ;;  %1800 = vmatpush.msra.mxu3 %v1617_v56  ;;  %v1206_v25 = vpop.f32.mrf.mxu0 }
 0x1be   : > { %1744 = vmatpush.msra.mxu0 %v1536_v57  ;;  %1761 = vmatpush.msra.mxu1 %v1612_v58  ;;  %v1821_v58 = vperm.slane %v1818_v41, 1 }
 0x1bf   : > { %1784 = vmatpush.msra.mxu2 %v1537_v59  ;;  %1801 = vmatpush.msra.mxu3 %v1613_v60 }
 0x1c0   : > { %1745 = vmatpush.msra.mxu0 %v1532_v61  ;;  %1762 = vmatpush.msra.mxu1 %v1608_v62  ;;  %v1835_v61 = vperm.slane %v1832_v44, 1 }
 0x1c1   : > { %1785 = vmatpush.msra.mxu2 %v1533_v63  ;;  %1802 = vmatpush.msra.mxu3 %v1609_v0 }
 0x1c2   : > { %1746 = vmatpush.msra.mxu0 %v1528_v1  ;;  %1763 = vmatpush.msra.mxu1 %v1604_v2 }
 0x1c3   : > { %1786 = vmatpush.msra.mxu2 %v1529_v3  ;;  %1803 = vmatpush.msra.mxu3 %v1605_v4  ;;  %v1246_v27 = vpop.f32.mrf.mxu2 }
 0x1c4   : > { %1747 = vmatpush.msra.mxu0 %v1524_v5  ;;  %1764 = vmatpush.msra.mxu1 %v1600_v6  ;;  %v1226_v26 = vpop.f32.mrf.mxu1 }
 0x1c5   : > { %1787 = vmatpush.msra.mxu2 %v1525_v8  ;;  %1804 = vmatpush.msra.mxu3 %v1601_v9  ;;  %v1227_v38 = vadd.f32 %v1226_v26, %v1206_v25  ;;  %v1822_v8 = vperm.slane %v1818_v41, 2 }
 0x1c6   : > { %1748 = vmatpush.msra.mxu0 %v1520_v10  ;;  %1765 = vmatpush.msra.mxu1 %v1596_v11  ;;  %v1836_v11 = vperm.slane %v1832_v44, 2 }
 0x1c7   : > { %1788 = vmatpush.msra.mxu2 %v1521_v12  ;;  %1805 = vmatpush.msra.mxu3 %v1597_v13  ;;  %v1286_v29 = vpop.f32.mrf.mxu0 }
 0x1c8   : > { %1749 = vmatpush.msra.mxu0 %v1516_v14  ;;  %1766 = vmatpush.msra.mxu1 %v1592_v16 }
 0x1c9   : > { %1789 = vmatpush.msra.mxu2 %v1517_v17  ;;  %1806 = vmatpush.msra.mxu3 %v1593_v18 }
 0x1ca   : > { %1750 = vmatmul.f32.vlgmr.msra.gmra.mxu0 %v2662_v15  ;;  %1790 = vmatmul.f32.vlgmr.msra.gmra.mxu2 %v2662_v15  ;;  %v1266_v28 = vpop.f32.mrf.mxu3 }
 0x1cb   : > { %1767 = vmatpush.msra.mxu1 %v1588_v19  ;;  %1807 = vmatpush.msra.mxu3 %v1589_v21  ;;  %v1267_v48 = vadd.f32 %v1266_v28, %v1246_v27  ;;  %v1823_v21 = vperm.slane %v1818_v41, 3 }
 0x1cd   : > { %1768 = vmatpush.msra.mxu1 %v1584_v7  ;;  %1808 = vmatpush.msra.mxu3 %v1585_v22  ;;  %v1326_v30 = vpop.f32.mrf.mxu2 }
 0x1ce   : > { %v1306_v15 = vpop.f32.mrf.mxu1 }
 0x1cf   : > { %1769 = vmatpush.msra.mxu1 %v1580_v23  ;;  %1809 = vmatpush.msra.mxu3 %v1581_v24  ;;  %v1307_v1 = vadd.f32 %v1306_v15, %v1286_v29  ;;  %v1837_v23 = vperm.slane %v1832_v44, 3 }
 0x1d0   : > { %1770 = vmatmul.f32.vlgmr.msra.gmra.mxu1 %v2667_v31  ;;  %1810 = vmatmul.f32.vlgmr.msra.gmra.mxu3 %v2667_v31 }
 0x1d4   : > { %v1346_v32 = vpop.f32.mrf.mxu3 }
 0x1d5   : > { %v1347_v9 = vadd.f32 %v1346_v32, %v1326_v30 }
 0x1e1   : > { %v1366_v33 = vpop.f32.mrf.mxu0 }
 0x1e2   : > { %v1367_v31 = vadd.f32 %v1366_v33, %v1227_v38 }
 0x1e7   : > { %v1406_v34 = vpop.f32.mrf.mxu2 }
 0x1e8   : > { %v1386_v20 = vpop.f32.mrf.mxu1  ;;  %v1407_v51 = vadd.f32 %v1406_v34, %v1267_v48 }
 0x1e9   : > { %v1387_v45 = vadd.f32 %v1386_v20, %v1367_v31 }
 0x1ee   : > { %v1426_v35 = vpop.f32.mrf.mxu3 }
 0x1ef   : > { %v1427_v55 = vadd.f32 %v1426_v35, %v1407_v51 }
 0x203   : > { %v1446_v36 = vpop.f32.mrf.mxu0 }
 0x204   : > { %v1447_v2 = vadd.f32 %v1446_v36, %v1307_v1 }
 0x209   : > { %v1486_v39 = vpop.f32.mrf.mxu2 }
 0x20a   : > { %v1466_v37 = vpop.f32.mrf.mxu1  ;;  %v1487_v12 = vadd.f32 %v1486_v39, %v1347_v9 }
 0x20b   : > { %v1467_v5 = vadd.f32 %v1466_v37, %v1447_v2 }
 0x210   : > { %v1506_v40 = vpop.f32.mrf.mxu3 }
 0x211   : > { %v1507_v17 = vadd.f32 %v1506_v40, %v1487_v12 }
 0x225   : > { %v1671_v42 = vpop.f32.mrf.mxu0 }
 0x22b   : > { %v1711_v53 = vpop.f32.mrf.mxu2 }
 0x22c   : > { %v1691_v43 = vpop.f32.mrf.mxu1 }
 0x22d   : > { %v1692_v46 = vadd.f32 %v1691_v43, %v1671_v42 }
 0x22f   : > { %v1814_v49 = vadd.f32 %v1692_v46, %v1387_v45 }
 0x231   : > { %v1828_v52 = vmul.f32 %v1820_v47, %v1814_v49 }
 0x232   : > { %v1731_v54 = vpop.f32.mrf.mxu3 }
 0x233   : > { %v1842_v56 = vadd.f32 %v1834_v50, %v1828_v52  ;;  %v1732_v57 = vadd.f32 %v1731_v54, %v1711_v53 }
 0x235   : > { %v1846_v59 = vmax.f32 %v1842_v56, 0.0  ;;  %v1815_v60 = vadd.f32 %v1732_v57, %v1427_v55 }
 0x237   : > { %1850 = vst [vmem:[%s2676_s2] sm:$0xff] %v1846_v59  ;;  %v1829_v62 = vmul.f32 %v1821_v58, %v1815_v60 }
 0x239   : > { %v1843_v63 = vadd.f32 %v1835_v61, %v1829_v62 }
 0x23b   : > { %v1847_v0 = vmax.f32 %v1843_v63, 0.0 }
 0x23d   : > { %1851 = vst [vmem:[%s2676_s2 + $0x8] sm:$0xff] %v1847_v0 }
 0x247   : > { %v1751_v3 = vpop.f32.mrf.mxu0 }
 0x24d   : > { %v1771_v4 = vpop.f32.mrf.mxu1  ;;  %v1791_v14 = vpop.f32.mrf.mxu2 }
 0x24e   : > { %v1772_v6 = vadd.f32 %v1771_v4, %v1751_v3 }
 0x250   : > { %v1816_v10 = vadd.f32 %v1772_v6, %v1467_v5 }
 0x252   : > { %v1830_v13 = vmul.f32 %v1822_v8, %v1816_v10 }
 0x253   : > { %v1811_v16 = vpop.f32.mrf.mxu3 }
 0x254   : > { %v1844_v18 = vadd.f32 %v1836_v11, %v1830_v13  ;;  %v1812_v19 = vadd.f32 %v1811_v16, %v1791_v14 }
 0x256   : > { %v1848_v7 = vmax.f32 %v1844_v18, 0.0  ;;  %v1817_v22 = vadd.f32 %v1812_v19, %v1507_v17 }
 0x258   : > { %1852 = vst [vmem:[%s2676_s2 + $0x10] sm:$0xff] %v1848_v7  ;;  %v1831_v24 = vmul.f32 %v1823_v21, %v1817_v22 }
 0x25a   : > { %v1845_v25 = vadd.f32 %v1837_v23, %v1831_v24 }
 0x25c   : > { %v1849_v26 = vmax.f32 %v1845_v25, 0.0 }
 0x25e   : > { %1853 = vst [vmem:[%s2676_s2 + $0x18] sm:$0xff] %v1849_v26 }
 0x25f   : > { %2375 = shalt.err (!%p2372_p9)
}
 0x260   : > { %2052 = dma.vmem_to_hbm [thread:$0]  (%p2576_p4), %s1869_s10, 512, %s1871_s16, %s1855_s8  }
 0x261 PF: > { %s1882_s30 = sand.u32 1, %s2414_s24   ;;  %p2737_p10 = scmp.ge.s32.totalorder %s2426_s27, 2 }
 0x262   : > { %s1883_s1 = scalar_lea.sflag [#allocation6], %s1882_s30 }
 0x263   : > { %p2078_p13 = pnand %p2737_p10, %p2580_p6 }
 0x265   : > { %p2079_p11 = pneg %p2078_p13 }
 0x267   : > { %2409 = dma.done.wait (%p2079_p11), %s1883_s1, 512  }
 0x268   : > { %2411 = vsyncadd (%p2079_p11), %s1883_s1, 4294966784  ;;  %p23_p0 = scmp.ge.s32.totalorder %s2550_s12, 4   ;;  %s2738_s24 = smov %s2418_s25 }
 0x269   : > { %s2739_s25 = smov %s2422_s26  ;;  %s2740_s26 = smov %s2561_s17 }
 0x26a   : > { %s2741_s27 = smov %s2550_s12  ;;  %25 = sbr.rel (!%p23_p0) target bundleno = 11 (0xb), region = 123 }
 0x26f   :  { %1889 = vsyncpa [#allocation5], 1 }
 0x270   :  { %1891 = vsyncpa [#allocation5 + $0x1], 1 }
 0x271   :  { %1892 = vsyncpa [#allocation8], 1 }
 0x272   :  { %1893 = vsyncpa [#allocation11], 1 }
 0x273   :  { %1894 = vsyncpa [#allocation14], 1 }
 0x274   :  { %1895 = vsyncpa [#allocation6], 1 }
 0x275   :  { %1897 = vsyncpa [#allocation6 + $0x1], 1 }

</bundles_post_ra>
